<compile_context>
chip_gen: v7x
topology: tpu7x:2x2x1
jax: 0.10.0
libtpu: 0.0.40
codegen_flags: <defaults>
</compile_context>

<pallas_src>
import functools

import jax
import jax.numpy as jnp
from jax.experimental import pallas as pl
from jax.experimental.pallas import tpu as pltpu


def _round_up(x, m):
    return ((x + m - 1) // m) * m


def conv_block_kernel(x_ref, w_ref, shift_ref, out_ref, xpad_ref, slab_ref,
                      *, k, p, H, W, Wp, Ho, Wo, Lout):
    # x_ref:     (Cin, H, W)        one unpadded image, bf16
    # w_ref:     (Cout, k*k*Cin)    fused-K conv weights, BN scale pre-folded, bf16
    # shift_ref: (Cout, 1)          BN shift = beta - mean * scale, f32
    # out_ref:   (Cout, Lden)       lane-dense flat NCHW output, f32
    # xpad_ref:  (Cin, Lin)         f32 scratch: zero-padded image, flat (Hp*Wp)
    # slab_ref:  (k*k*Cin, Lout)    f32 scratch: lane-shifted taps (im2col slab)
    cin = x_ref.shape[0]

    # 1) Conv zero-padding built in VMEM (no wrapper-side jnp.pad HBM passes).
    #    Re-zeroed every step so the kernel stays correct when the grid axis is
    #    sharded across TensorCores ("parallel").
    xpad_ref[...] = jnp.zeros_like(xpad_ref)
    for h in range(H):
        xpad_ref[:, pl.ds((h + p) * Wp + p, W)] = x_ref[:, h, :].astype(xpad_ref.dtype)

    # 2) Stage the k*k lane-shifted taps once into the fused-K slab.
    #    Row block [t*Cin, (t+1)*Cin) holds tap t = kh*k + kw.
    for kh in range(k):
        for kw in range(k):
            t = kh * k + kw
            off = kh * Wp + kw                       # static flat lane offset of tap
            slab_ref[pl.ds(t * cin, cin), :] = xpad_ref[:, pl.ds(off, Lout)]

    # 3) Single MXU matmul over K = k*k*Cin (f32 accumulation) + BN shift + ReLU.
    acc = jnp.dot(w_ref[...].astype(jnp.float32), slab_ref[...],
                  preferred_element_type=jnp.float32)
    y = jnp.maximum(acc + shift_ref[...], 0.0)

    # 4) Compact the Wp-strided rows into a lane-dense NCHW-flat output
    #    (drops the wrap-around garbage columns in-kernel; no wrapper slice pass).
    lden = out_ref.shape[1]
    if lden > Ho * Wo:  # zero the lane-padding tail (not hit at the demo shape)
        out_ref[:, pl.ds(Ho * Wo, lden - Ho * Wo)] = jnp.zeros(
            (out_ref.shape[0], lden - Ho * Wo), out_ref.dtype)
    for h in range(Ho):
        out_ref[:, pl.ds(h * Wo, Wo)] = y[:, h * Wp: h * Wp + Wo].astype(out_ref.dtype)


@functools.partial(jax.jit, static_argnames=("kernel_size", "stride", "padding"))
def conv_block_forward(x_nchw, weight, bn_scale, bn_shift,
                       kernel_size=3, stride=1, padding=1):
    """x_nchw: (N, Cin, H, W); weight: (Cout, Cin, k, k) (PyTorch layouts)."""
    if stride != 1:
        # TODO(synk): stride > 1 would need a strided output gather; the
        # instantiated module uses stride=1, which this kernel covers.
        raise NotImplementedError("Pallas ConvBlock kernel implements stride=1 only")

    N, Cin, H, W = x_nchw.shape
    Cout = weight.shape[0]
    k, p = kernel_size, padding
    Hp, Wp = H + 2 * p, W + 2 * p
    Ho, Wo = Hp - k + 1, Wp - k + 1

    # Lane-dense sizing of the flat spatial axes.
    Lout = _round_up(Ho * Wp, 128)                    # padded-width positions computed
    Lin = _round_up(Lout + (k - 1) * (Wp + 1), 128)   # max tap offset + Lout (>= Hp*Wp)
    Lden = _round_up(Ho * Wo, 128)                    # compacted (true) output positions

    # HBM-resident activation in bf16 (mem-bound op: halves input DMA bytes).
    x_in = x_nchw.astype(jnp.bfloat16)

    # Fold BatchNorm scale into the conv weights (f32), order taps to match the
    # slab rows (kh, kw, cin), then cast to bf16.
    w_scaled = weight.astype(jnp.float32) * bn_scale.reshape(Cout, 1, 1, 1)
    w_fused = jnp.transpose(w_scaled, (0, 2, 3, 1)).reshape(Cout, k * k * Cin)
    w_in = w_fused.astype(jnp.bfloat16)

    shift2d = bn_shift.reshape(Cout, 1).astype(jnp.float32)

    kernel = functools.partial(conv_block_kernel, k=k, p=p, H=H, W=W, Wp=Wp,
                               Ho=Ho, Wo=Wo, Lout=Lout)

    out_flat = pl.pallas_call(
        kernel,
        out_shape=jax.ShapeDtypeStruct((N, Cout, Lden), jnp.float32),
        grid_spec=pltpu.PrefetchScalarGridSpec(
            num_scalar_prefetch=0,
            # TODO(synk): for large H*W add an L-tile grid axis with a
            # (k-1)*(Wp+1)-lane halo so v7x gets >=4 steps per TensorCore and the
            # per-step VMEM working set stays bounded; unnecessary at these sizes.
            grid=(N,),
            in_specs=[
                pl.BlockSpec((None, Cin, H, W), lambda n: (n, 0, 0, 0)),
                pl.BlockSpec((Cout, k * k * Cin), lambda n: (0, 0)),
                pl.BlockSpec((Cout, 1), lambda n: (0, 0)),
            ],
            out_specs=pl.BlockSpec((None, Cout, Lden), lambda n: (n, 0, 0)),
            scratch_shapes=[
                pltpu.VMEM((Cin, Lin), jnp.float32),           # zero-padded image
                pltpu.VMEM((k * k * Cin, Lout), jnp.float32),  # fused-K tap slab
            ],
        ),
        compiler_params=pltpu.CompilerParams(
            dimension_semantics=("parallel",),
            # Conservative budget that also fits v7x's 64 MiB physical VMEM;
            # the actual per-step working set here is ~100 KiB.
            vmem_limit_bytes=32 * 1024 * 1024,
        ),
    )(x_in, w_in, shift2d)

    out = out_flat if Lden == Ho * Wo else out_flat[:, :, : Ho * Wo]
    return out.reshape(N, Cout, Ho, Wo)   # already NCHW; reshape is metadata-only


def _reference_forward(x_nchw, weight, bn_scale, bn_shift, stride, padding):
    """Plain-JAX reference using the same bf16 input/weight rounding as the kernel."""
    Cout = weight.shape[0]
    w_scaled = weight.astype(jnp.float32) * bn_scale.reshape(Cout, 1, 1, 1)
    xq = x_nchw.astype(jnp.bfloat16).astype(jnp.float32)
    wq = w_scaled.astype(jnp.bfloat16).astype(jnp.float32)
    y = jax.lax.conv_general_dilated(
        xq, wq, window_strides=(stride, stride),
        padding=[(padding, padding), (padding, padding)],
        dimension_numbers=("NCHW", "OIHW", "NCHW"),
        precision=jax.lax.Precision.HIGHEST)
    y = y + bn_shift.reshape(1, Cout, 1, 1)
    return jnp.maximum(y, 0.0)


if __name__ == "__main__":
    # Small shapes consistent with the module: batch=2, Cin=4, Cout=8, 16x16.
    N, Cin, Cout, H, W = 2, 4, 8, 16, 16
    k, stride, pad = 3, 1, 1

    key = jax.random.PRNGKey(0)
    kx, kw_key = jax.random.split(key)
    x = jax.random.normal(kx, (N, Cin, H, W), dtype=jnp.float32)
    weight = jax.random.normal(kw_key, (Cout, Cin, k, k), dtype=jnp.float32) * 0.1

    # Deterministic BatchNorm2d params / running stats (eval mode).
    eps = 1e-5
    gamma = 1.0 + 0.1 * jnp.arange(Cout, dtype=jnp.float32)
    beta = 0.05 * jnp.arange(Cout, dtype=jnp.float32)
    running_mean = 0.01 * jnp.arange(Cout, dtype=jnp.float32)
    running_var = 1.0 + 0.02 * jnp.arange(Cout, dtype=jnp.float32)
    bn_scale = gamma / jnp.sqrt(running_var + eps)
    bn_shift = beta - running_mean * bn_scale

    out = conv_block_forward(x, weight, bn_scale, bn_shift,
                             kernel_size=k, stride=stride, padding=pad)
    out = jax.block_until_ready(out)

    ref = _reference_forward(x, weight, bn_scale, bn_shift, stride, pad)
    assert out.shape == (N, Cout, H, W), out.shape
    assert jnp.allclose(out, ref, atol=1e-3, rtol=1e-3), (
        "mismatch vs reference, max abs err = %f"
        % float(jnp.max(jnp.abs(out - ref))))

    print("KERNEL_OK")
</pallas_src>

<mosaic_0001>
module attributes {stable_mosaic.version = 11 : i64} {
  func.func @conv_block_kernel(%arg0: i32, %arg1: memref<1x4x16x16xbf16, #tpu.memory_space<vmem>>, %arg2: memref<8x36xbf16, #tpu.memory_space<vmem>>, %arg3: memref<8x1xf32, #tpu.memory_space<vmem>>, %arg4: memref<1x8x256xf32, #tpu.memory_space<vmem>>, %arg5: memref<4x512xf32, #tpu.memory_space<vmem>>, %arg6: memref<36x384xf32, #tpu.memory_space<vmem>>) attributes {dimension_semantics = [#tpu.dimension_semantics<parallel>], iteration_bounds = array<i64: 2>, scalar_prefetch = 0 : i64, scratch_operands = 2 : i64, tpu.core_type = #tpu.core_type<tc>, window_params = [{transform_indices = @transform_0, window_bounds = array<i64: 1, 4, 16, 16>}, {pipeline_mode = #tpu.pipeline_mode<synchronous>, transform_indices = @transform_1, window_bounds = array<i64: 8, 36>}, {pipeline_mode = #tpu.pipeline_mode<synchronous>, transform_indices = @transform_2, window_bounds = array<i64: 8, 1>}, {transform_indices = @transform_3, window_bounds = array<i64: 1, 8, 256>}]} {
    %cst = arith.constant 0.000000e+00 : f32
    %0 = vector.broadcast %cst : f32 to vector<4x512xf32>
    %c0 = arith.constant 0 : index
    %c0_0 = arith.constant 0 : index
    %1 = vector.load %arg5[%c0, %c0_0] : memref<4x512xf32, #tpu.memory_space<vmem>>, vector<4x512xf32>
    tpu.vector_store %arg5[%c0, %c0_0], %0 {strides = array<i32>} : memref<4x512xf32, #tpu.memory_space<vmem>>, vector<4x512xf32>,
    %c0_1 = arith.constant 0 : index
    %c0_2 = arith.constant 0 : index
    %c0_3 = arith.constant 0 : index
    %c0_4 = arith.constant 0 : index
    %2 = vector.load %arg1[%c0_1, %c0_2, %c0_3, %c0_4] : memref<1x4x16x16xbf16, #tpu.memory_space<vmem>>, vector<1x4x1x16xbf16>
    %3 = vector.shape_cast %2 : vector<1x4x1x16xbf16> to vector<4x16xbf16>
    %4 = arith.extf %3 : vector<4x16xbf16> to vector<4x16xf32>
    %c0_5 = arith.constant 0 : index
    %c19 = arith.constant 19 : index
    %5 = vector.load %arg5[%c0_5, %c19] : memref<4x512xf32, #tpu.memory_space<vmem>>, vector<4x16xf32>
    tpu.vector_store %arg5[%c0_5, %c19], %4 {strides = array<i32>} : memref<4x512xf32, #tpu.memory_space<vmem>>, vector<4x16xf32>,
    %c0_6 = arith.constant 0 : index
    %c0_7 = arith.constant 0 : index
    %c1 = arith.constant 1 : index
    %c0_8 = arith.constant 0 : index
    %6 = vector.load %arg1[%c0_6, %c0_7, %c1, %c0_8] : memref<1x4x16x16xbf16, #tpu.memory_space<vmem>>, vector<1x4x1x16xbf16>
    %7 = vector.shape_cast %6 : vector<1x4x1x16xbf16> to vector<4x16xbf16>
    %8 = arith.extf %7 : vector<4x16xbf16> to vector<4x16xf32>
    %c0_9 = arith.constant 0 : index
    %c37 = arith.constant 37 : index
    %9 = vector.load %arg5[%c0_9, %c37] : memref<4x512xf32, #tpu.memory_space<vmem>>, vector<4x16xf32>
    tpu.vector_store %arg5[%c0_9, %c37], %8 {strides = array<i32>} : memref<4x512xf32, #tpu.memory_space<vmem>>, vector<4x16xf32>,
    %c0_10 = arith.constant 0 : index
    %c0_11 = arith.constant 0 : index
    %c2 = arith.constant 2 : index
    %c0_12 = arith.constant 0 : index
    %10 = vector.load %arg1[%c0_10, %c0_11, %c2, %c0_12] : memref<1x4x16x16xbf16, #tpu.memory_space<vmem>>, vector<1x4x1x16xbf16>
    %11 = vector.shape_cast %10 : vector<1x4x1x16xbf16> to vector<4x16xbf16>
    %12 = arith.extf %11 : vector<4x16xbf16> to vector<4x16xf32>
    %c0_13 = arith.constant 0 : index
    %c55 = arith.constant 55 : index
    %13 = vector.load %arg5[%c0_13, %c55] : memref<4x512xf32, #tpu.memory_space<vmem>>, vector<4x16xf32>
    tpu.vector_store %arg5[%c0_13, %c55], %12 {strides = array<i32>} : memref<4x512xf32, #tpu.memory_space<vmem>>, vector<4x16xf32>,
    %c0_14 = arith.constant 0 : index
    %c0_15 = arith.constant 0 : index
    %c3 = arith.constant 3 : index
    %c0_16 = arith.constant 0 : index
    %14 = vector.load %arg1[%c0_14, %c0_15, %c3, %c0_16] : memref<1x4x16x16xbf16, #tpu.memory_space<vmem>>, vector<1x4x1x16xbf16>
    %15 = vector.shape_cast %14 : vector<1x4x1x16xbf16> to vector<4x16xbf16>
    %16 = arith.extf %15 : vector<4x16xbf16> to vector<4x16xf32>
    %c0_17 = arith.constant 0 : index
    %c73 = arith.constant 73 : index
    %17 = vector.load %arg5[%c0_17, %c73] : memref<4x512xf32, #tpu.memory_space<vmem>>, vector<4x16xf32>
    tpu.vector_store %arg5[%c0_17, %c73], %16 {strides = array<i32>} : memref<4x512xf32, #tpu.memory_space<vmem>>, vector<4x16xf32>,
    %c0_18 = arith.constant 0 : index
    %c0_19 = arith.constant 0 : index
    %c4 = arith.constant 4 : index
    %c0_20 = arith.constant 0 : index
    %18 = vector.load %arg1[%c0_18, %c0_19, %c4, %c0_20] : memref<1x4x16x16xbf16, #tpu.memory_space<vmem>>, vector<1x4x1x16xbf16>
    %19 = vector.shape_cast %18 : vector<1x4x1x16xbf16> to vector<4x16xbf16>
    %20 = arith.extf %19 : vector<4x16xbf16> to vector<4x16xf32>
    %c0_21 = arith.constant 0 : index
    %c91 = arith.constant 91 : index
    %21 = vector.load %arg5[%c0_21, %c91] : memref<4x512xf32, #tpu.memory_space<vmem>>, vector<4x16xf32>
    tpu.vector_store %arg5[%c0_21, %c91], %20 {strides = array<i32>} : memref<4x512xf32, #tpu.memory_space<vmem>>, vector<4x16xf32>,
    %c0_22 = arith.constant 0 : index
    %c0_23 = arith.constant 0 : index
    %c5 = arith.constant 5 : index
    %c0_24 = arith.constant 0 : index
    %22 = vector.load %arg1[%c0_22, %c0_23, %c5, %c0_24] : memref<1x4x16x16xbf16, #tpu.memory_space<vmem>>, vector<1x4x1x16xbf16>
    %23 = vector.shape_cast %22 : vector<1x4x1x16xbf16> to vector<4x16xbf16>
    %24 = arith.extf %23 : vector<4x16xbf16> to vector<4x16xf32>
    %c0_25 = arith.constant 0 : index
    %c109 = arith.constant 109 : index
    %25 = vector.load %arg5[%c0_25, %c109] : memref<4x512xf32, #tpu.memory_space<vmem>>, vector<4x16xf32>
    tpu.vector_store %arg5[%c0_25, %c109], %24 {strides = array<i32>} : memref<4x512xf32, #tpu.memory_space<vmem>>, vector<4x16xf32>,
    %c0_26 = arith.constant 0 : index
    %c0_27 = arith.constant 0 : index
    %c6 = arith.constant 6 : index
    %c0_28 = arith.constant 0 : index
    %26 = vector.load %arg1[%c0_26, %c0_27, %c6, %c0_28] : memref<1x4x16x16xbf16, #tpu.memory_space<vmem>>, vector<1x4x1x16xbf16>
    %27 = vector.shape_cast %26 : vector<1x4x1x16xbf16> to vector<4x16xbf16>
    %28 = arith.extf %27 : vector<4x16xbf16> to vector<4x16xf32>
    %c0_29 = arith.constant 0 : index
    %c127 = arith.constant 127 : index
    %29 = vector.load %arg5[%c0_29, %c127] : memref<4x512xf32, #tpu.memory_space<vmem>>, vector<4x16xf32>
    tpu.vector_store %arg5[%c0_29, %c127], %28 {strides = array<i32>} : memref<4x512xf32, #tpu.memory_space<vmem>>, vector<4x16xf32>,
    %c0_30 = arith.constant 0 : index
    %c0_31 = arith.constant 0 : index
    %c7 = arith.constant 7 : index
    %c0_32 = arith.constant 0 : index
    %30 = vector.load %arg1[%c0_30, %c0_31, %c7, %c0_32] : memref<1x4x16x16xbf16, #tpu.memory_space<vmem>>, vector<1x4x1x16xbf16>
    %31 = vector.shape_cast %30 : vector<1x4x1x16xbf16> to vector<4x16xbf16>
    %32 = arith.extf %31 : vector<4x16xbf16> to vector<4x16xf32>
    %c0_33 = arith.constant 0 : index
    %c145 = arith.constant 145 : index
    %33 = vector.load %arg5[%c0_33, %c145] : memref<4x512xf32, #tpu.memory_space<vmem>>, vector<4x16xf32>
    tpu.vector_store %arg5[%c0_33, %c145], %32 {strides = array<i32>} : memref<4x512xf32, #tpu.memory_space<vmem>>, vector<4x16xf32>,
    %c0_34 = arith.constant 0 : index
    %c0_35 = arith.constant 0 : index
    %c8 = arith.constant 8 : index
    %c0_36 = arith.constant 0 : index
    %34 = vector.load %arg1[%c0_34, %c0_35, %c8, %c0_36] : memref<1x4x16x16xbf16, #tpu.memory_space<vmem>>, vector<1x4x1x16xbf16>
    %35 = vector.shape_cast %34 : vector<1x4x1x16xbf16> to vector<4x16xbf16>
    %36 = arith.extf %35 : vector<4x16xbf16> to vector<4x16xf32>
    %c0_37 = arith.constant 0 : index
    %c163 = arith.constant 163 : index
    %37 = vector.load %arg5[%c0_37, %c163] : memref<4x512xf32, #tpu.memory_space<vmem>>, vector<4x16xf32>
    tpu.vector_store %arg5[%c0_37, %c163], %36 {strides = array<i32>} : memref<4x512xf32, #tpu.memory_space<vmem>>, vector<4x16xf32>,
    %c0_38 = arith.constant 0 : index
    %c0_39 = arith.constant 0 : index
    %c9 = arith.constant 9 : index
    %c0_40 = arith.constant 0 : index
    %38 = vector.load %arg1[%c0_38, %c0_39, %c9, %c0_40] : memref<1x4x16x16xbf16, #tpu.memory_space<vmem>>, vector<1x4x1x16xbf16>
    %39 = vector.shape_cast %38 : vector<1x4x1x16xbf16> to vector<4x16xbf16>
    %40 = arith.extf %39 : vector<4x16xbf16> to vector<4x16xf32>
    %c0_41 = arith.constant 0 : index
    %c181 = arith.constant 181 : index
    %41 = vector.load %arg5[%c0_41, %c181] : memref<4x512xf32, #tpu.memory_space<vmem>>, vector<4x16xf32>
    tpu.vector_store %arg5[%c0_41, %c181], %40 {strides = array<i32>} : memref<4x512xf32, #tpu.memory_space<vmem>>, vector<4x16xf32>,
    %c0_42 = arith.constant 0 : index
    %c0_43 = arith.constant 0 : index
    %c10 = arith.constant 10 : index
    %c0_44 = arith.constant 0 : index
    %42 = vector.load %arg1[%c0_42, %c0_43, %c10, %c0_44] : memref<1x4x16x16xbf16, #tpu.memory_space<vmem>>, vector<1x4x1x16xbf16>
    %43 = vector.shape_cast %42 : vector<1x4x1x16xbf16> to vector<4x16xbf16>
    %44 = arith.extf %43 : vector<4x16xbf16> to vector<4x16xf32>
    %c0_45 = arith.constant 0 : index
    %c199 = arith.constant 199 : index
    %45 = vector.load %arg5[%c0_45, %c199] : memref<4x512xf32, #tpu.memory_space<vmem>>, vector<4x16xf32>
    tpu.vector_store %arg5[%c0_45, %c199], %44 {strides = array<i32>} : memref<4x512xf32, #tpu.memory_space<vmem>>, vector<4x16xf32>,
    %c0_46 = arith.constant 0 : index
    %c0_47 = arith.constant 0 : index
    %c11 = arith.constant 11 : index
    %c0_48 = arith.constant 0 : index
    %46 = vector.load %arg1[%c0_46, %c0_47, %c11, %c0_48] : memref<1x4x16x16xbf16, #tpu.memory_space<vmem>>, vector<1x4x1x16xbf16>
    %47 = vector.shape_cast %46 : vector<1x4x1x16xbf16> to vector<4x16xbf16>
    %48 = arith.extf %47 : vector<4x16xbf16> to vector<4x16xf32>
    %c0_49 = arith.constant 0 : index
    %c217 = arith.constant 217 : index
    %49 = vector.load %arg5[%c0_49, %c217] : memref<4x512xf32, #tpu.memory_space<vmem>>, vector<4x16xf32>
    tpu.vector_store %arg5[%c0_49, %c217], %48 {strides = array<i32>} : memref<4x512xf32, #tpu.memory_space<vmem>>, vector<4x16xf32>,
    %c0_50 = arith.constant 0 : index
    %c0_51 = arith.constant 0 : index
    %c12 = arith.constant 12 : index
    %c0_52 = arith.constant 0 : index
    %50 = vector.load %arg1[%c0_50, %c0_51, %c12, %c0_52] : memref<1x4x16x16xbf16, #tpu.memory_space<vmem>>, vector<1x4x1x16xbf16>
    %51 = vector.shape_cast %50 : vector<1x4x1x16xbf16> to vector<4x16xbf16>
    %52 = arith.extf %51 : vector<4x16xbf16> to vector<4x16xf32>
    %c0_53 = arith.constant 0 : index
    %c235 = arith.constant 235 : index
    %53 = vector.load %arg5[%c0_53, %c235] : memref<4x512xf32, #tpu.memory_space<vmem>>, vector<4x16xf32>
    tpu.vector_store %arg5[%c0_53, %c235], %52 {strides = array<i32>} : memref<4x512xf32, #tpu.memory_space<vmem>>, vector<4x16xf32>,
    %c0_54 = arith.constant 0 : index
    %c0_55 = arith.constant 0 : index
    %c13 = arith.constant 13 : index
    %c0_56 = arith.constant 0 : index
    %54 = vector.load %arg1[%c0_54, %c0_55, %c13, %c0_56] : memref<1x4x16x16xbf16, #tpu.memory_space<vmem>>, vector<1x4x1x16xbf16>
    %55 = vector.shape_cast %54 : vector<1x4x1x16xbf16> to vector<4x16xbf16>
    %56 = arith.extf %55 : vector<4x16xbf16> to vector<4x16xf32>
    %c0_57 = arith.constant 0 : index
    %c253 = arith.constant 253 : index
    %57 = vector.load %arg5[%c0_57, %c253] : memref<4x512xf32, #tpu.memory_space<vmem>>, vector<4x16xf32>
    tpu.vector_store %arg5[%c0_57, %c253], %56 {strides = array<i32>} : memref<4x512xf32, #tpu.memory_space<vmem>>, vector<4x16xf32>,
    %c0_58 = arith.constant 0 : index
    %c0_59 = arith.constant 0 : index
    %c14 = arith.constant 14 : index
    %c0_60 = arith.constant 0 : index
    %58 = vector.load %arg1[%c0_58, %c0_59, %c14, %c0_60] : memref<1x4x16x16xbf16, #tpu.memory_space<vmem>>, vector<1x4x1x16xbf16>
    %59 = vector.shape_cast %58 : vector<1x4x1x16xbf16> to vector<4x16xbf16>
    %60 = arith.extf %59 : vector<4x16xbf16> to vector<4x16xf32>
    %c0_61 = arith.constant 0 : index
    %c271 = arith.constant 271 : index
    %61 = vector.load %arg5[%c0_61, %c271] : memref<4x512xf32, #tpu.memory_space<vmem>>, vector<4x16xf32>
    tpu.vector_store %arg5[%c0_61, %c271], %60 {strides = array<i32>} : memref<4x512xf32, #tpu.memory_space<vmem>>, vector<4x16xf32>,
    %c0_62 = arith.constant 0 : index
    %c0_63 = arith.constant 0 : index
    %c15 = arith.constant 15 : index
    %c0_64 = arith.constant 0 : index
    %62 = vector.load %arg1[%c0_62, %c0_63, %c15, %c0_64] : memref<1x4x16x16xbf16, #tpu.memory_space<vmem>>, vector<1x4x1x16xbf16>
    %63 = vector.shape_cast %62 : vector<1x4x1x16xbf16> to vector<4x16xbf16>
    %64 = arith.extf %63 : vector<4x16xbf16> to vector<4x16xf32>
    %c0_65 = arith.constant 0 : index
    %c289 = arith.constant 289 : index
    %65 = vector.load %arg5[%c0_65, %c289] : memref<4x512xf32, #tpu.memory_space<vmem>>, vector<4x16xf32>
    tpu.vector_store %arg5[%c0_65, %c289], %64 {strides = array<i32>} : memref<4x512xf32, #tpu.memory_space<vmem>>, vector<4x16xf32>,
    %c0_66 = arith.constant 0 : index
    %c0_67 = arith.constant 0 : index
    %66 = vector.load %arg5[%c0_66, %c0_67] : memref<4x512xf32, #tpu.memory_space<vmem>>, vector<4x384xf32>
    %c0_68 = arith.constant 0 : index
    %c0_69 = arith.constant 0 : index
    %67 = vector.load %arg6[%c0_68, %c0_69] : memref<36x384xf32, #tpu.memory_space<vmem>>, vector<4x384xf32>
    tpu.vector_store %arg6[%c0_68, %c0_69], %66 {strides = array<i32>} : memref<36x384xf32, #tpu.memory_space<vmem>>, vector<4x384xf32>,
    %c0_70 = arith.constant 0 : index
    %c1_71 = arith.constant 1 : index
    %68 = vector.load %arg5[%c0_70, %c1_71] : memref<4x512xf32, #tpu.memory_space<vmem>>, vector<4x384xf32>
    %c4_72 = arith.constant 4 : index
    %c0_73 = arith.constant 0 : index
    %69 = vector.load %arg6[%c4_72, %c0_73] : memref<36x384xf32, #tpu.memory_space<vmem>>, vector<4x384xf32>
    tpu.vector_store %arg6[%c4_72, %c0_73], %68 {strides = array<i32>} : memref<36x384xf32, #tpu.memory_space<vmem>>, vector<4x384xf32>,
    %c0_74 = arith.constant 0 : index
    %c2_75 = arith.constant 2 : index
    %70 = vector.load %arg5[%c0_74, %c2_75] : memref<4x512xf32, #tpu.memory_space<vmem>>, vector<4x384xf32>
    %c8_76 = arith.constant 8 : index
    %c0_77 = arith.constant 0 : index
    %71 = vector.load %arg6[%c8_76, %c0_77] : memref<36x384xf32, #tpu.memory_space<vmem>>, vector<4x384xf32>
    tpu.vector_store %arg6[%c8_76, %c0_77], %70 {strides = array<i32>} : memref<36x384xf32, #tpu.memory_space<vmem>>, vector<4x384xf32>,
    %c0_78 = arith.constant 0 : index
    %c18 = arith.constant 18 : index
    %72 = vector.load %arg5[%c0_78, %c18] : memref<4x512xf32, #tpu.memory_space<vmem>>, vector<4x384xf32>
    %c12_79 = arith.constant 12 : index
    %c0_80 = arith.constant 0 : index
    %73 = vector.load %arg6[%c12_79, %c0_80] : memref<36x384xf32, #tpu.memory_space<vmem>>, vector<4x384xf32>
    tpu.vector_store %arg6[%c12_79, %c0_80], %72 {strides = array<i32>} : memref<36x384xf32, #tpu.memory_space<vmem>>, vector<4x384xf32>,
    %c0_81 = arith.constant 0 : index
    %c19_82 = arith.constant 19 : index
    %74 = vector.load %arg5[%c0_81, %c19_82] : memref<4x512xf32, #tpu.memory_space<vmem>>, vector<4x384xf32>
    %c16 = arith.constant 16 : index
    %c0_83 = arith.constant 0 : index
    %75 = vector.load %arg6[%c16, %c0_83] : memref<36x384xf32, #tpu.memory_space<vmem>>, vector<4x384xf32>
    tpu.vector_store %arg6[%c16, %c0_83], %74 {strides = array<i32>} : memref<36x384xf32, #tpu.memory_space<vmem>>, vector<4x384xf32>,
    %c0_84 = arith.constant 0 : index
    %c20 = arith.constant 20 : index
    %76 = vector.load %arg5[%c0_84, %c20] : memref<4x512xf32, #tpu.memory_space<vmem>>, vector<4x384xf32>
    %c20_85 = arith.constant 20 : index
    %c0_86 = arith.constant 0 : index
    %77 = vector.load %arg6[%c20_85, %c0_86] : memref<36x384xf32, #tpu.memory_space<vmem>>, vector<4x384xf32>
    tpu.vector_store %arg6[%c20_85, %c0_86], %76 {strides = array<i32>} : memref<36x384xf32, #tpu.memory_space<vmem>>, vector<4x384xf32>,
    %c0_87 = arith.constant 0 : index
    %c36 = arith.constant 36 : index
    %78 = vector.load %arg5[%c0_87, %c36] : memref<4x512xf32, #tpu.memory_space<vmem>>, vector<4x384xf32>
    %c24 = arith.constant 24 : index
    %c0_88 = arith.constant 0 : index
    %79 = vector.load %arg6[%c24, %c0_88] : memref<36x384xf32, #tpu.memory_space<vmem>>, vector<4x384xf32>
    tpu.vector_store %arg6[%c24, %c0_88], %78 {strides = array<i32>} : memref<36x384xf32, #tpu.memory_space<vmem>>, vector<4x384xf32>,
    %c0_89 = arith.constant 0 : index
    %c37_90 = arith.constant 37 : index
    %80 = vector.load %arg5[%c0_89, %c37_90] : memref<4x512xf32, #tpu.memory_space<vmem>>, vector<4x384xf32>
    %c28 = arith.constant 28 : index
    %c0_91 = arith.constant 0 : index
    %81 = vector.load %arg6[%c28, %c0_91] : memref<36x384xf32, #tpu.memory_space<vmem>>, vector<4x384xf32>
    tpu.vector_store %arg6[%c28, %c0_91], %80 {strides = array<i32>} : memref<36x384xf32, #tpu.memory_space<vmem>>, vector<4x384xf32>,
    %c0_92 = arith.constant 0 : index
    %c38 = arith.constant 38 : index
    %82 = vector.load %arg5[%c0_92, %c38] : memref<4x512xf32, #tpu.memory_space<vmem>>, vector<4x384xf32>
    %c32 = arith.constant 32 : index
    %c0_93 = arith.constant 0 : index
    %83 = vector.load %arg6[%c32, %c0_93] : memref<36x384xf32, #tpu.memory_space<vmem>>, vector<4x384xf32>
    tpu.vector_store %arg6[%c32, %c0_93], %82 {strides = array<i32>} : memref<36x384xf32, #tpu.memory_space<vmem>>, vector<4x384xf32>,
    %c0_94 = arith.constant 0 : index
    %c0_95 = arith.constant 0 : index
    %84 = vector.load %arg2[%c0_94, %c0_95] : memref<8x36xbf16, #tpu.memory_space<vmem>>, vector<8x36xbf16>
    %85 = arith.extf %84 : vector<8x36xbf16> to vector<8x36xf32>
    %c0_96 = arith.constant 0 : index
    %c0_97 = arith.constant 0 : index
    %86 = vector.load %arg6[%c0_96, %c0_97] : memref<36x384xf32, #tpu.memory_space<vmem>>, vector<36x384xf32>
    %cst_98 = arith.constant dense<0.000000e+00> : vector<8x384xf32>
    %87 = tpu.matmul %85, %86, %cst_98 {dimension_numbers = #tpu.dot_dimension_numbers<[1], [0], [0], [1], [0, 0, 1, 1], [], []>} : vector<8x36xf32>, vector<36x384xf32>, vector<8x384xf32> -> vector<8x384xf32>
    %c0_99 = arith.constant 0 : index
    %c0_100 = arith.constant 0 : index
    %88 = vector.load %arg3[%c0_99, %c0_100] : memref<8x1xf32, #tpu.memory_space<vmem>>, vector<8x1xf32>
    %89 = vector.broadcast %88 : vector<8x1xf32> to vector<8x384xf32>
    %90 = arith.addf %87, %89 : vector<8x384xf32>
    %cst_101 = arith.constant 0.000000e+00 : f32
    %91 = vector.broadcast %cst_101 : f32 to vector<8x384xf32>
    %92 = arith.maximumf %90, %91 : vector<8x384xf32>
    %93 = vector.extract_strided_slice %92 {offsets = [0, 0], sizes = [8, 16], strides = [1, 1]} : vector<8x384xf32> to vector<8x16xf32>
    %c0_102 = arith.constant 0 : index
    %c0_103 = arith.constant 0 : index
    %c0_104 = arith.constant 0 : index
    %94 = vector.load %arg4[%c0_102, %c0_103, %c0_104] : memref<1x8x256xf32, #tpu.memory_space<vmem>>, vector<1x8x16xf32>
    %95 = vector.shape_cast %94 : vector<1x8x16xf32> to vector<8x16xf32>
    %96 = vector.shape_cast %93 : vector<8x16xf32> to vector<1x8x16xf32>
    tpu.vector_store %arg4[%c0_102, %c0_103, %c0_104], %96 {strides = array<i32>} : memref<1x8x256xf32, #tpu.memory_space<vmem>>, vector<1x8x16xf32>,
    %97 = vector.extract_strided_slice %92 {offsets = [0, 18], sizes = [8, 16], strides = [1, 1]} : vector<8x384xf32> to vector<8x16xf32>
    %c0_105 = arith.constant 0 : index
    %c0_106 = arith.constant 0 : index
    %c16_107 = arith.constant 16 : index
    %98 = vector.load %arg4[%c0_105, %c0_106, %c16_107] : memref<1x8x256xf32, #tpu.memory_space<vmem>>, vector<1x8x16xf32>
    %99 = vector.shape_cast %98 : vector<1x8x16xf32> to vector<8x16xf32>
    %100 = vector.shape_cast %97 : vector<8x16xf32> to vector<1x8x16xf32>
    tpu.vector_store %arg4[%c0_105, %c0_106, %c16_107], %100 {strides = array<i32>} : memref<1x8x256xf32, #tpu.memory_space<vmem>>, vector<1x8x16xf32>,
    %101 = vector.extract_strided_slice %92 {offsets = [0, 36], sizes = [8, 16], strides = [1, 1]} : vector<8x384xf32> to vector<8x16xf32>
    %c0_108 = arith.constant 0 : index
    %c0_109 = arith.constant 0 : index
    %c32_110 = arith.constant 32 : index
    %102 = vector.load %arg4[%c0_108, %c0_109, %c32_110] : memref<1x8x256xf32, #tpu.memory_space<vmem>>, vector<1x8x16xf32>
    %103 = vector.shape_cast %102 : vector<1x8x16xf32> to vector<8x16xf32>
    %104 = vector.shape_cast %101 : vector<8x16xf32> to vector<1x8x16xf32>
    tpu.vector_store %arg4[%c0_108, %c0_109, %c32_110], %104 {strides = array<i32>} : memref<1x8x256xf32, #tpu.memory_space<vmem>>, vector<1x8x16xf32>,
    %105 = vector.extract_strided_slice %92 {offsets = [0, 54], sizes = [8, 16], strides = [1, 1]} : vector<8x384xf32> to vector<8x16xf32>
    %c0_111 = arith.constant 0 : index
    %c0_112 = arith.constant 0 : index
    %c48 = arith.constant 48 : index
    %106 = vector.load %arg4[%c0_111, %c0_112, %c48] : memref<1x8x256xf32, #tpu.memory_space<vmem>>, vector<1x8x16xf32>
    %107 = vector.shape_cast %106 : vector<1x8x16xf32> to vector<8x16xf32>
    %108 = vector.shape_cast %105 : vector<8x16xf32> to vector<1x8x16xf32>
    tpu.vector_store %arg4[%c0_111, %c0_112, %c48], %108 {strides = array<i32>} : memref<1x8x256xf32, #tpu.memory_space<vmem>>, vector<1x8x16xf32>,
    %109 = vector.extract_strided_slice %92 {offsets = [0, 72], sizes = [8, 16], strides = [1, 1]} : vector<8x384xf32> to vector<8x16xf32>
    %c0_113 = arith.constant 0 : index
    %c0_114 = arith.constant 0 : index
    %c64 = arith.constant 64 : index
    %110 = vector.load %arg4[%c0_113, %c0_114, %c64] : memref<1x8x256xf32, #tpu.memory_space<vmem>>, vector<1x8x16xf32>
    %111 = vector.shape_cast %110 : vector<1x8x16xf32> to vector<8x16xf32>
    %112 = vector.shape_cast %109 : vector<8x16xf32> to vector<1x8x16xf32>
    tpu.vector_store %arg4[%c0_113, %c0_114, %c64], %112 {strides = array<i32>} : memref<1x8x256xf32, #tpu.memory_space<vmem>>, vector<1x8x16xf32>,
    %113 = vector.extract_strided_slice %92 {offsets = [0, 90], sizes = [8, 16], strides = [1, 1]} : vector<8x384xf32> to vector<8x16xf32>
    %c0_115 = arith.constant 0 : index
    %c0_116 = arith.constant 0 : index
    %c80 = arith.constant 80 : index
    %114 = vector.load %arg4[%c0_115, %c0_116, %c80] : memref<1x8x256xf32, #tpu.memory_space<vmem>>, vector<1x8x16xf32>
    %115 = vector.shape_cast %114 : vector<1x8x16xf32> to vector<8x16xf32>
    %116 = vector.shape_cast %113 : vector<8x16xf32> to vector<1x8x16xf32>
    tpu.vector_store %arg4[%c0_115, %c0_116, %c80], %116 {strides = array<i32>} : memref<1x8x256xf32, #tpu.memory_space<vmem>>, vector<1x8x16xf32>,
    %117 = vector.extract_strided_slice %92 {offsets = [0, 108], sizes = [8, 16], strides = [1, 1]} : vector<8x384xf32> to vector<8x16xf32>
    %c0_117 = arith.constant 0 : index
    %c0_118 = arith.constant 0 : index
    %c96 = arith.constant 96 : index
    %118 = vector.load %arg4[%c0_117, %c0_118, %c96] : memref<1x8x256xf32, #tpu.memory_space<vmem>>, vector<1x8x16xf32>
    %119 = vector.shape_cast %118 : vector<1x8x16xf32> to vector<8x16xf32>
    %120 = vector.shape_cast %117 : vector<8x16xf32> to vector<1x8x16xf32>
    tpu.vector_store %arg4[%c0_117, %c0_118, %c96], %120 {strides = array<i32>} : memref<1x8x256xf32, #tpu.memory_space<vmem>>, vector<1x8x16xf32>,
    %121 = vector.extract_strided_slice %92 {offsets = [0, 126], sizes = [8, 16], strides = [1, 1]} : vector<8x384xf32> to vector<8x16xf32>
    %c0_119 = arith.constant 0 : index
    %c0_120 = arith.constant 0 : index
    %c112 = arith.constant 112 : index
    %122 = vector.load %arg4[%c0_119, %c0_120, %c112] : memref<1x8x256xf32, #tpu.memory_space<vmem>>, vector<1x8x16xf32>
    %123 = vector.shape_cast %122 : vector<1x8x16xf32> to vector<8x16xf32>
    %124 = vector.shape_cast %121 : vector<8x16xf32> to vector<1x8x16xf32>
    tpu.vector_store %arg4[%c0_119, %c0_120, %c112], %124 {strides = array<i32>} : memref<1x8x256xf32, #tpu.memory_space<vmem>>, vector<1x8x16xf32>,
    %125 = vector.extract_strided_slice %92 {offsets = [0, 144], sizes = [8, 16], strides = [1, 1]} : vector<8x384xf32> to vector<8x16xf32>
    %c0_121 = arith.constant 0 : index
    %c0_122 = arith.constant 0 : index
    %c128 = arith.constant 128 : index
    %126 = vector.load %arg4[%c0_121, %c0_122, %c128] : memref<1x8x256xf32, #tpu.memory_space<vmem>>, vector<1x8x16xf32>
    %127 = vector.shape_cast %126 : vector<1x8x16xf32> to vector<8x16xf32>
    %128 = vector.shape_cast %125 : vector<8x16xf32> to vector<1x8x16xf32>
    tpu.vector_store %arg4[%c0_121, %c0_122, %c128], %128 {strides = array<i32>} : memref<1x8x256xf32, #tpu.memory_space<vmem>>, vector<1x8x16xf32>,
    %129 = vector.extract_strided_slice %92 {offsets = [0, 162], sizes = [8, 16], strides = [1, 1]} : vector<8x384xf32> to vector<8x16xf32>
    %c0_123 = arith.constant 0 : index
    %c0_124 = arith.constant 0 : index
    %c144 = arith.constant 144 : index
    %130 = vector.load %arg4[%c0_123, %c0_124, %c144] : memref<1x8x256xf32, #tpu.memory_space<vmem>>, vector<1x8x16xf32>
    %131 = vector.shape_cast %130 : vector<1x8x16xf32> to vector<8x16xf32>
    %132 = vector.shape_cast %129 : vector<8x16xf32> to vector<1x8x16xf32>
    tpu.vector_store %arg4[%c0_123, %c0_124, %c144], %132 {strides = array<i32>} : memref<1x8x256xf32, #tpu.memory_space<vmem>>, vector<1x8x16xf32>,
    %133 = vector.extract_strided_slice %92 {offsets = [0, 180], sizes = [8, 16], strides = [1, 1]} : vector<8x384xf32> to vector<8x16xf32>
    %c0_125 = arith.constant 0 : index
    %c0_126 = arith.constant 0 : index
    %c160 = arith.constant 160 : index
    %134 = vector.load %arg4[%c0_125, %c0_126, %c160] : memref<1x8x256xf32, #tpu.memory_space<vmem>>, vector<1x8x16xf32>
    %135 = vector.shape_cast %134 : vector<1x8x16xf32> to vector<8x16xf32>
    %136 = vector.shape_cast %133 : vector<8x16xf32> to vector<1x8x16xf32>
    tpu.vector_store %arg4[%c0_125, %c0_126, %c160], %136 {strides = array<i32>} : memref<1x8x256xf32, #tpu.memory_space<vmem>>, vector<1x8x16xf32>,
    %137 = vector.extract_strided_slice %92 {offsets = [0, 198], sizes = [8, 16], strides = [1, 1]} : vector<8x384xf32> to vector<8x16xf32>
    %c0_127 = arith.constant 0 : index
    %c0_128 = arith.constant 0 : index
    %c176 = arith.constant 176 : index
    %138 = vector.load %arg4[%c0_127, %c0_128, %c176] : memref<1x8x256xf32, #tpu.memory_space<vmem>>, vector<1x8x16xf32>
    %139 = vector.shape_cast %138 : vector<1x8x16xf32> to vector<8x16xf32>
    %140 = vector.shape_cast %137 : vector<8x16xf32> to vector<1x8x16xf32>
    tpu.vector_store %arg4[%c0_127, %c0_128, %c176], %140 {strides = array<i32>} : memref<1x8x256xf32, #tpu.memory_space<vmem>>, vector<1x8x16xf32>,
    %141 = vector.extract_strided_slice %92 {offsets = [0, 216], sizes = [8, 16], strides = [1, 1]} : vector<8x384xf32> to vector<8x16xf32>
    %c0_129 = arith.constant 0 : index
    %c0_130 = arith.constant 0 : index
    %c192 = arith.constant 192 : index
    %142 = vector.load %arg4[%c0_129, %c0_130, %c192] : memref<1x8x256xf32, #tpu.memory_space<vmem>>, vector<1x8x16xf32>
    %143 = vector.shape_cast %142 : vector<1x8x16xf32> to vector<8x16xf32>
    %144 = vector.shape_cast %141 : vector<8x16xf32> to vector<1x8x16xf32>
    tpu.vector_store %arg4[%c0_129, %c0_130, %c192], %144 {strides = array<i32>} : memref<1x8x256xf32, #tpu.memory_space<vmem>>, vector<1x8x16xf32>,
    %145 = vector.extract_strided_slice %92 {offsets = [0, 234], sizes = [8, 16], strides = [1, 1]} : vector<8x384xf32> to vector<8x16xf32>
    %c0_131 = arith.constant 0 : index
    %c0_132 = arith.constant 0 : index
    %c208 = arith.constant 208 : index
    %146 = vector.load %arg4[%c0_131, %c0_132, %c208] : memref<1x8x256xf32, #tpu.memory_space<vmem>>, vector<1x8x16xf32>
    %147 = vector.shape_cast %146 : vector<1x8x16xf32> to vector<8x16xf32>
    %148 = vector.shape_cast %145 : vector<8x16xf32> to vector<1x8x16xf32>
    tpu.vector_store %arg4[%c0_131, %c0_132, %c208], %148 {strides = array<i32>} : memref<1x8x256xf32, #tpu.memory_space<vmem>>, vector<1x8x16xf32>,
    %149 = vector.extract_strided_slice %92 {offsets = [0, 252], sizes = [8, 16], strides = [1, 1]} : vector<8x384xf32> to vector<8x16xf32>
    %c0_133 = arith.constant 0 : index
    %c0_134 = arith.constant 0 : index
    %c224 = arith.constant 224 : index
    %150 = vector.load %arg4[%c0_133, %c0_134, %c224] : memref<1x8x256xf32, #tpu.memory_space<vmem>>, vector<1x8x16xf32>
    %151 = vector.shape_cast %150 : vector<1x8x16xf32> to vector<8x16xf32>
    %152 = vector.shape_cast %149 : vector<8x16xf32> to vector<1x8x16xf32>
    tpu.vector_store %arg4[%c0_133, %c0_134, %c224], %152 {strides = array<i32>} : memref<1x8x256xf32, #tpu.memory_space<vmem>>, vector<1x8x16xf32>,
    %153 = vector.extract_strided_slice %92 {offsets = [0, 270], sizes = [8, 16], strides = [1, 1]} : vector<8x384xf32> to vector<8x16xf32>
    %c0_135 = arith.constant 0 : index
    %c0_136 = arith.constant 0 : index
    %c240 = arith.constant 240 : index
    %154 = vector.load %arg4[%c0_135, %c0_136, %c240] : memref<1x8x256xf32, #tpu.memory_space<vmem>>, vector<1x8x16xf32>
    %155 = vector.shape_cast %154 : vector<1x8x16xf32> to vector<8x16xf32>
    %156 = vector.shape_cast %153 : vector<8x16xf32> to vector<1x8x16xf32>
    tpu.vector_store %arg4[%c0_135, %c0_136, %c240], %156 {strides = array<i32>} : memref<1x8x256xf32, #tpu.memory_space<vmem>>, vector<1x8x16xf32>,
    return
  }
  func.func @transform_0(%arg0: i32) -> (i32, i32, i32, i32) {
    %c0_i32 = arith.constant 0 : i32
    %c0_i32_0 = arith.constant 0 : i32
    %c0_i32_1 = arith.constant 0 : i32
    %c0_i32_2 = arith.constant 0 : i32
    return %arg0, %c0_i32, %c0_i32_0, %c0_i32_1 : i32, i32, i32, i32
  }
  func.func @transform_1(%arg0: i32) -> (i32, i32) {
    %c0_i32 = arith.constant 0 : i32
    %c0_i32_0 = arith.constant 0 : i32
    %c0_i32_1 = arith.constant 0 : i32
    return %c0_i32, %c0_i32_0 : i32, i32
  }
  func.func @transform_2(%arg0: i32) -> (i32, i32) {
    %c0_i32 = arith.constant 0 : i32
    %c0_i32_0 = arith.constant 0 : i32
    %c0_i32_1 = arith.constant 0 : i32
    return %c0_i32, %c0_i32_0 : i32, i32
  }
  func.func @transform_3(%arg0: i32) -> (i32, i32, i32) {
    %c0_i32 = arith.constant 0 : i32
    %c0_i32_0 = arith.constant 0 : i32
    %c0_i32_1 = arith.constant 0 : i32
    return %arg0, %c0_i32, %c0_i32_0 : i32, i32, i32
  }
}

</mosaic_0001>

<bundles_post_ra>
// kernel: conv_block_forward.1
= control target key start
LH: loop header
LB: loop body
LE: loop exit
PB: predicated region body
PF: predicated region fallthrough
CT: control target
= control target key end

     0   :  { %s1318_s12 = smov 0   ;;  %s1608_s0 = inlined_call_operand.vmem [shape: bf16[2,4,16,16], index: 0, kind: input, shape index: {}]   ;;  %s1609_s1 = inlined_call_operand.vmem [shape: bf16[8,36], index: 1, kind: input, shape index: {}]   ;;  %s1610_s2 = inlined_call_operand.vmem [shape: f32[8,1], index: 2, kind: input, shape index: {}]   ;;  %s1611_s3 = inlined_call_operand.vmem [shape: f32[2,8,256], index: 3, kind: output, shape index: {}]  }
   0x1 LB: > { %s1152_s13 = sadd.s32 4294967295, %s1259_s12   ;;  %p1156_p0 = scmp.ge.s32.totalorder %s1259_s12, 1  ;;  %s1259_s12 = sphi %s1318_s12, %s13_s12  }
   0x2   : > { %p137_p1 = scmp.lt.s32.totalorder %s1259_s12, 3 }
   0x4   : > { %p138_p2 = pnand %p1156_p0, %p137_p1 }
   0x5   : > { %p161_p3 = scmp.lt.s32.totalorder (!%p138_p2), %s1152_s13, 1  ;;  %vm186_vm0 = vcmask (!%p138_p2), 1041409   ;;  %vm188_vm1 = vcmask (!%p138_p2), 1045509   ;;  %v1261_v0 = vmov (!%p138_p2), 0.0   ;;  %vm191_vm2 = vcmask (!%p138_p2), 1042434   ;;  %s1262_s18 = smov (!%p138_p2), 55  }
   0x6   : > { %141 = sbr.rel (%p138_p2) target bundleno = 748 (0x2ec), region = 32  ;;  %171 = vst [vmem:[#allocation2] sm:$0xff] (!%p138_p2), %v1261_v0  ;;  %172 = vst [vmem:[#allocation2 + $0x8] sm:$0xff] (!%p138_p2), %v1261_v0  ;;  %937 = vmatprep.mubr.f32.mxu0 (!%p138_p2), %v1261_v0  ;;  %vm193_vm3 = vcmask (!%p138_p2), 1046534   ;;  %vm196_vm4 = vcmask (!%p138_p2), 1043459   ;;  %vm198_vm5 = vcmask (!%p138_p2), 1047559  }
   0x7   : > { %s1263_s19 = smov (!%p138_p2), 19   ;;  %s1264_s20 = smov (!%p138_p2), 73   ;;  %vm203_vm6 = vcmask (!%p138_p2), 281752   ;;  %vm229_vm7 = vcmask (!%p138_p2), 429352   ;;  %vm255_vm8 = vcmask (!%p138_p2), 576952   ;;  %vm281_vm9 = vcmask (!%p138_p2), 724552  }
   0x8   : > { %s1265_s21 = smov (!%p138_p2), 37   ;;  %s1266_s22 = smov (!%p138_p2), 53   ;;  %vm311_vm10 = vcmask (!%p138_p2), 872152   ;;  %vm374_vm11 = vcmask (!%p138_p2), 1044472   ;;  %vm375_vm12 = vcmask (!%p138_p2), 121860   ;;  %vm371_vm13 = vcmask (!%p138_p2), 1039360  }
   0x9   : > { %s1267_s23 = smov (!%p138_p2), 35   ;;  %s1268_s24 = smov (!%p138_p2), 91   ;;  %vm341_vm14 = vcmask (!%p138_p2), 1019752   ;;  %vm376_vm15 = vmor (!%p138_p2), %vm375_vm12, %vm374_vm11  ;;  %vm635_vm11 = vcmask (!%p138_p2), 396552   ;;  %vm1284_vm12 = vmmov (!%p138_p2), 0  }
   0xa   : > { %s1269_s25 = smov (!%p138_p2), 127   ;;  %s1270_s26 = smov (!%p138_p2), 17   ;;  %1186 = vmatprep.mubr.msk.f32.mxu1 (!%p138_p2), %vm1284_vm12, %v1261_v0  ;;  %vm1048_vm12 = vcmask (!%p138_p2), 917248  }
   0xb   : > { %s1271_s27 = smov (!%p138_p2), 109   ;;  %s1272_s28 = smov (!%p138_p2), 125  }
   0xc   : > { %s1273_s29 = smov (!%p138_p2), 71   ;;  %s1274_s30 = smov (!%p138_p2), 89  }
   0xd   : > { %s1613_s13 = smov (!%p161_p3, %s1152_s13), 1  ;;  %s1275_s4 = smov 107  }
   0xe   : > { %s1168_s14 = sshll.u32 %s1613_s13, 5  ;;  %s1276_s5 = smov 15  }
   0xf   : > { %s1335_s17 = scalar_lea.vmem %s1608_s0, %s1168_s14  ;;  %s1277_s6 = smov 33  }
  0x10   : > { %v231_v1 = vld [vmem:[%s1335_s17] sm:$0x2]  ;;  %v232_v2 = vld [vmem:[%s1335_s17 + $0x8] sm:$0x2]  ;;  %v233_v3 = vld [vmem:[%s1335_s17 + $0x10] sm:$0x2] }
  0x11   : > { %v234_v4 = vld [vmem:[%s1335_s17 + $0x18] sm:$0x2]  ;;  %v235_v5 = vunpack.c.l.bf16 %v231_v1  ;;  %v236_v6 = vunpack.c.l.bf16 %v232_v2  ;;  %v173_v7 = vld [vmem:[%s1335_s17] sm:$0x1]  ;;  %v174_v8 = vld [vmem:[%s1335_s17 + $0x8] sm:$0x1]  ;;  %v237_v9 = vunpack.c.l.bf16 %v233_v3 }
  0x12   : > { %v238_v10 = vunpack.c.l.bf16 %v234_v4  ;;  %v175_v11 = vld [vmem:[%s1335_s17 + $0x10] sm:$0x1]  ;;  %v176_v12 = vld [vmem:[%s1335_s17 + $0x18] sm:$0x1]  ;;  %v177_v13 = vunpack.c.l.bf16 %v173_v7  ;;  %v178_v14 = vunpack.c.l.bf16 %v174_v8  ;;  %v257_v15 = vld [vmem:[%s1335_s17] sm:$0x2] }
  0x13   : > { %v243_v16 = vrot.slane %v235_v5, 2  ;;  %v244_v17 = vrot.slane %v236_v6, 1  ;;  %v179_v18 = vunpack.c.l.bf16 %v175_v11  ;;  %v180_v19 = vunpack.c.l.bf16 %v176_v12  ;;  %v258_v20 = vld [vmem:[%s1335_s17 + $0x8] sm:$0x2]  ;;  %v259_v21 = vld [vmem:[%s1335_s17 + $0x10] sm:$0x2] }
  0x14   : > { %v249_v22 = vrot.slane %v238_v10, 7  ;;  %v185_v23 = vrot.slane %v178_v14, 7  ;;  %v260_v24 = vld [vmem:[%s1335_s17 + $0x18] sm:$0x2]  ;;  %v261_v25 = vunpack.c.l.bf16 %v257_v15  ;;  %v262_v26 = vunpack.c.l.bf16 %v258_v20  ;;  %v205_v31 = vld [vmem:[%s1335_s17] sm:$0x1] }
  0x15   : > { %v245_v27 = vsel %vm186_vm0, %v244_v17, %v243_v16  ;;  %v190_v28 = vrot.slane %v179_v18, 6  ;;  %v195_v29 = vrot.slane %v180_v19, 5  ;;  %v263_v30 = vunpack.c.l.bf16 %v259_v21  ;;  %v206_v32 = vld [vmem:[%s1335_s17 + $0x8] sm:$0x1]  ;;  %v207_v37 = vld [vmem:[%s1335_s17 + $0x10] sm:$0x1] }
  0x16   : > { %v246_v33 = vsel %vm188_vm1, %v244_v17, %v245_v27  ;;  %v187_v34 = vsel %vm186_vm0, %v185_v23, %v177_v13  ;;  %v264_v35 = vunpack.c.l.bf16 %v260_v24  ;;  %v269_v36 = vrot.slane %v261_v25, 3  ;;  %v208_v42 = vld [vmem:[%s1335_s17 + $0x18] sm:$0x1]  ;;  %v434_v51 = vld [vmem:[%s1335_s17 + $0x4] sm:$0x1]  ;;  %s1278_s7 = smov 126  }
  0x17   : > { %v247_v38 = vsel %vm191_vm2, %v237_v9, %v246_v33  ;;  %v189_v39 = vsel %vm188_vm1, %v185_v23, %v187_v34  ;;  %v270_v40 = vrot.slane %v262_v26, 2  ;;  %v273_v41 = vrot.slane %v263_v30, 1  ;;  %v435_v52 = vld [vmem:[%s1335_s17 + $0xc] sm:$0x1]  ;;  %v436_v57 = vld [vmem:[%s1335_s17 + $0x14] sm:$0x1] }
  0x18   : > { %v248_v43 = vsel %vm193_vm3, %v237_v9, %v247_v38  ;;  %v192_v44 = vsel %vm191_vm2, %v190_v28, %v189_v39  ;;  %v209_v45 = vunpack.c.l.bf16 %v205_v31  ;;  %v210_v46 = vunpack.c.l.bf16 %v206_v32  ;;  %v437_v58 = vld [vmem:[%s1335_s17 + $0x1c] sm:$0x1]  ;;  %v408_v63 = vld [vmem:[%s1335_s17 + $0x4] sm:$0x1]  ;;  %v409_v5 = vld [vmem:[%s1335_s17 + $0xc] sm:$0x1] }
  0x19   : > { %v250_v47 = vsel %vm196_vm4, %v249_v22, %v248_v43  ;;  %v194_v48 = vsel %vm193_vm3, %v190_v28, %v192_v44  ;;  %v271_v49 = vsel %vm186_vm0, %v270_v40, %v269_v36  ;;  %v211_v50 = vunpack.c.l.bf16 %v207_v37  ;;  %v410_v10 = vld [vmem:[%s1335_s17 + $0x14] sm:$0x1]  ;;  %v411_v11 = vld [vmem:[%s1335_s17 + $0x1c] sm:$0x1]  ;;  %v283_v16 = vld [vmem:[%s1335_s17] sm:$0x4] }
  0x1a   : > { %v251_v53 = vsel %vm198_vm5, %v249_v22, %v250_v47  ;;  %v197_v54 = vsel %vm196_vm4, %v195_v29, %v194_v48  ;;  %v272_v55 = vsel %vm188_vm1, %v270_v40, %v271_v49  ;;  %v212_v56 = vunpack.c.l.bf16 %v208_v42  ;;  %v284_v25 = vld [vmem:[%s1335_s17 + $0x8] sm:$0x4]  ;;  %v285_v26 = vld [vmem:[%s1335_s17 + $0x10] sm:$0x4]  ;;  %v286_v30 = vld [vmem:[%s1335_s17 + $0x18] sm:$0x4] }
  0x1b   : > { %252 = vrot.lane.b32.xlu1 %v251_v53, %s1262_s18  ;;  %v199_v59 = vsel %vm198_vm5, %v195_v29, %v197_v54  ;;  %v274_v60 = vsel %vm191_vm2, %v273_v41, %v272_v55  ;;  %v217_v61 = vrot.slane %v209_v45, 1  ;;  %v220_v62 = vrot.slane %v211_v50, 7  ;;  %v343_v40 = vld [vmem:[%s1335_s17] sm:$0x8]  ;;  %s1279_s8 = smov 108   ;;  %s1280_s9 = smov 110  }
  0x1c   : > { %200 = vrot.lane.b32.xlu0 %v199_v59, %s1263_s19  ;;  %v275_v1 = vsel %vm193_vm3, %v273_v41, %v274_v60  ;;  %v223_v2 = vrot.slane %v212_v56, 6  ;;  %v438_v3 = vunpack.c.l.bf16 %v434_v51  ;;  %v439_v4 = vunpack.c.l.bf16 %v435_v52  ;;  %v344_v41 = vld [vmem:[%s1335_s17 + $0x8] sm:$0x8]  ;;  %v346_v51 = vld [vmem:[%s1335_s17 + $0x18] sm:$0x8]  ;;  %s1281_s10 = smov 92  }
  0x1d   : > { %v276_v6 = vsel %vm196_vm4, %v264_v35, %v275_v1  ;;  %v218_v7 = vsel %vm186_vm0, %v210_v46, %v217_v61  ;;  %v440_v8 = vunpack.c.l.bf16 %v436_v57  ;;  %v441_v9 = vunpack.c.l.bf16 %v437_v58  ;;  %v378_v56 = vld [vmem:[%s1335_s17] sm:$0x8]  ;;  %v379_v61 = vld [vmem:[%s1335_s17 + $0x8] sm:$0x8]  ;;  %s1282_s11 = smov 90   ;;  %s1169_s18 = sshll.u32 %s1613_s13, 4 }
  0x1e   : > { %v277_v12 = vsel %vm198_vm5, %v264_v35, %v276_v6  ;;  %v219_v13 = vsel %vm188_vm1, %v210_v46, %v218_v7  ;;  %v446_v14 = vrot.slane %v438_v3, 1  ;;  %v412_v15 = vunpack.c.l.bf16 %v408_v63  ;;  %v345_v46 = vld [vmem:[%s1335_s17 + $0x10] sm:$0x8]  ;;  %s1286_s13 = smov 100  }
  0x1f   : > { %278 = vrot.lane.b32.xlu1 %v277_v12, %s1264_s20  ;;  %v221_v17 = vsel %vm191_vm2, %v220_v62, %v219_v13  ;;  %v449_v18 = vrot.slane %v440_v8, 7  ;;  %v452_v19 = vrot.slane %v441_v9, 6  ;;  %v413_v20 = vunpack.c.l.bf16 %v409_v5  ;;  %v380_v3 = vld [vmem:[%s1335_s17 + $0x10] sm:$0x8] }
  0x20   : > { %v222_v21 = vsel %vm193_vm3, %v220_v62, %v221_v17  ;;  %v447_v22 = vsel %vm186_vm0, %v439_v4, %v446_v14  ;;  %v414_v23 = vunpack.c.l.bf16 %v410_v10  ;;  %v415_v24 = vunpack.c.l.bf16 %v411_v11 }
  0x21   : > { %v224_v27 = vsel %vm196_vm4, %v223_v2, %v222_v21  ;;  %v448_v28 = vsel %vm188_vm1, %v439_v4, %v447_v22  ;;  %v420_v29 = vrot.slane %v413_v20, 7  ;;  %v287_v31 = vunpack.c.l.bf16 %v283_v16  ;;  %v381_v4 = vld [vmem:[%s1335_s17 + $0x18] sm:$0x8]  ;;  %v313_v21 = vld [vmem:[%s1335_s17] sm:$0x4] }
  0x22   : > { %v225_v32 = vsel %vm198_vm5, %v223_v2, %v224_v27  ;;  %v450_v33 = vsel %vm191_vm2, %v449_v18, %v448_v28  ;;  %v423_v34 = vrot.slane %v414_v23, 6  ;;  %v426_v35 = vrot.slane %v415_v24, 5  ;;  %v314_v22 = vld [vmem:[%s1335_s17 + $0x8] sm:$0x4]  ;;  %v315_v27 = vld [vmem:[%s1335_s17 + $0x10] sm:$0x4] }
  0x23   : > { %226 = vrot.lane.b32.xlu0 %v225_v32, %s1265_s21  ;;  %v451_v36 = vsel %vm193_vm3, %v449_v18, %v450_v33  ;;  %v421_v37 = vsel %vm186_vm0, %v420_v29, %v412_v15  ;;  %v288_v38 = vunpack.c.l.bf16 %v284_v25  ;;  %v289_v39 = vunpack.c.l.bf16 %v285_v26  ;;  %v316_v28 = vld [vmem:[%s1335_s17 + $0x18] sm:$0x4]  ;;  %s1570_s21 = scalar_lea.vmem %s1611_s3, %s1169_s18 }
  0x24   : > { %v453_v42 = vsel %vm196_vm4, %v452_v19, %v451_v36  ;;  %v422_v43 = vsel %vm188_vm1, %v420_v29, %v421_v37  ;;  %v290_v44 = vunpack.c.l.bf16 %v286_v30  ;;  %v295_v45 = vcombine.high %v287_v31, %v287_v31 }
  0x25   : > { %v454_v47 = vsel %vm198_vm5, %v452_v19, %v453_v42  ;;  %v424_v48 = vsel %vm191_vm2, %v423_v34, %v422_v43  ;;  %v296_v49 = vcombine.high %v288_v38, %v288_v38  ;;  %v297_v50 = vcombine.high %v289_v39, %v289_v39  ;;  %v543_v42 = vld [vmem:[%s1335_s17 + $0xc] sm:$0x4] }
  0x26   : > { %455 = vrot.lane.b32.xlu1 %v454_v47, %s1266_s22  ;;  %v425_v52 = vsel %vm193_vm3, %v423_v34, %v424_v48  ;;  %v298_v53 = vcombine.high %v290_v44, %v290_v44  ;;  %v347_v54 = vunpack.c.l.bf16 %v343_v40  ;;  %v348_v55 = vunpack.c.l.bf16 %v344_v41  ;;  %v542_v41 = vld [vmem:[%s1335_s17 + $0x4] sm:$0x4]  ;;  %v544_v47 = vld [vmem:[%s1335_s17 + $0x14] sm:$0x4]  ;;  %s1287_s22 = smov 124  }
  0x27   : > { %v427_v57 = vsel %vm196_vm4, %v426_v35, %v425_v52  ;;  %v299_v58 = vrot.slane %v296_v49, 7  ;;  %v302_v59 = vrot.slane %v297_v50, 6  ;;  %v349_v60 = vunpack.c.l.bf16 %v345_v46  ;;  %v545_v52 = vld [vmem:[%s1335_s17 + $0x1c] sm:$0x4] }
  0x28   : > { %v428_v62 = vsel %vm198_vm5, %v426_v35, %v427_v57  ;;  %v305_v63 = vrot.slane %v298_v53, 5  ;;  %v350_v1 = vunpack.c.l.bf16 %v346_v51  ;;  %v355_v2 = vcombine.high %v347_v54, %v347_v54  ;;  %v460_v57 = vld [vmem:[%s1335_s17 + $0x4] sm:$0x2] }
  0x29   : > { %429 = vrot.lane.b32.xlu0 %v428_v62, %s1267_s23  ;;  %v300_v5 = vsel %vm186_vm0, %v299_v58, %v295_v45  ;;  %v356_v6 = vcombine.high %v348_v55, %v348_v55  ;;  %v357_v7 = vcombine.high %v349_v60, %v349_v60  ;;  %v382_v8 = vunpack.c.l.bf16 %v378_v56  ;;  %v461_v62 = vld [vmem:[%s1335_s17 + $0xc] sm:$0x2]  ;;  %s1288_s23 = smov 114  }
  0x2a   : > { %v301_v9 = vsel %vm188_vm1, %v299_v58, %v300_v5  ;;  %v358_v10 = vcombine.high %v350_v1, %v350_v1  ;;  %v359_v11 = vrot.slane %v355_v2, 2  ;;  %v383_v12 = vunpack.c.l.bf16 %v379_v61  ;;  %v463_v5 = vld [vmem:[%s1335_s17 + $0x1c] sm:$0x2] }
  0x2b   : > { %v303_v13 = vsel %vm191_vm2, %v302_v59, %v301_v9  ;;  %v360_v14 = vrot.slane %v356_v6, 1  ;;  %v384_v15 = vunpack.c.l.bf16 %v380_v3  ;;  %v385_v16 = vunpack.c.l.bf16 %v381_v4  ;;  %v462_v4 = vld [vmem:[%s1335_s17 + $0x14] sm:$0x2] }
  0x2c   : > { %v304_v17 = vsel %vm193_vm3, %v302_v59, %v303_v13  ;;  %v365_v18 = vrot.slane %v358_v10, 7  ;;  %v390_v19 = vcombine.high %v382_v8, %v382_v8  ;;  %v391_v20 = vcombine.high %v383_v12, %v383_v12 }
  0x2d   : > { %v306_v23 = vsel %vm196_vm4, %v305_v63, %v304_v17  ;;  %v361_v24 = vsel %vm186_vm0, %v360_v14, %v359_v11  ;;  %v392_v25 = vcombine.high %v384_v15, %v384_v15  ;;  %v393_v26 = vcombine.high %v385_v16, %v385_v16 }
  0x2e   : > { %v307_v29 = vsel %vm198_vm5, %v305_v63, %v306_v23  ;;  %v362_v30 = vsel %vm188_vm1, %v360_v14, %v361_v24  ;;  %v394_v31 = vrot.slane %v390_v19, 3  ;;  %v395_v32 = vrot.slane %v391_v20, 2  ;;  %v486_v14 = vld [vmem:[%s1335_s17 + $0x4] sm:$0x2]  ;;  %v487_v19 = vld [vmem:[%s1335_s17 + $0xc] sm:$0x2] }
  0x2f   : > { %308 = vrot.lane.b32.xlu1 %v307_v29, %s1268_s24  ;;  %v363_v33 = vsel %vm191_vm2, %v357_v7, %v362_v30  ;;  %v398_v34 = vrot.slane %v392_v25, 1  ;;  %v317_v35 = vunpack.c.l.bf16 %v313_v21  ;;  %v318_v36 = vunpack.c.l.bf16 %v314_v22  ;;  %v488_v20 = vld [vmem:[%s1335_s17 + $0x14] sm:$0x2]  ;;  %v489_v25 = vld [vmem:[%s1335_s17 + $0x1c] sm:$0x2] }
  0x30   : > { %v364_v37 = vsel %vm193_vm3, %v357_v7, %v363_v33  ;;  %v396_v38 = vsel %vm186_vm0, %v395_v32, %v394_v31  ;;  %v319_v39 = vunpack.c.l.bf16 %v315_v27  ;;  %v320_v40 = vunpack.c.l.bf16 %v316_v28 }
  0x31   : > { %v366_v43 = vsel %vm196_vm4, %v365_v18, %v364_v37  ;;  %v397_v44 = vsel %vm188_vm1, %v395_v32, %v396_v38  ;;  %v325_v45 = vcombine.high %v317_v35, %v317_v35  ;;  %v326_v46 = vcombine.high %v318_v36, %v318_v36  ;;  %v513_v35 = vld [vmem:[%s1335_s17 + $0xc] sm:$0x4] }
  0x32   : > { %v367_v48 = vsel %vm198_vm5, %v365_v18, %v366_v43  ;;  %v399_v49 = vsel %vm191_vm2, %v398_v34, %v397_v44  ;;  %v327_v50 = vcombine.high %v319_v39, %v319_v39  ;;  %v328_v51 = vcombine.high %v320_v40, %v320_v40  ;;  %v514_v39 = vld [vmem:[%s1335_s17 + $0x14] sm:$0x4]  ;;  %v515_v40 = vld [vmem:[%s1335_s17 + $0x1c] sm:$0x4] }
  0x33   : > { %368 = vrot.lane.b32.xlu0 %v367_v48, %s1269_s25  ;;  %v400_v53 = vsel %vm193_vm3, %v398_v34, %v399_v49  ;;  %v329_v54 = vrot.slane %v325_v45, 1  ;;  %v546_v55 = vunpack.c.l.bf16 %v542_v41  ;;  %v547_v56 = vunpack.c.l.bf16 %v543_v42 }
  0x34   : > { %v401_v58 = vsel %vm196_vm4, %v393_v26, %v400_v53  ;;  %v332_v59 = vrot.slane %v327_v50, 7  ;;  %v335_v60 = vrot.slane %v328_v51, 6  ;;  %v548_v61 = vunpack.c.l.bf16 %v544_v47 }
  0x35   : > { %v402_v63 = vsel %vm198_vm5, %v393_v26, %v401_v58  ;;  %v330_v1 = vsel %vm186_vm0, %v326_v46, %v329_v54  ;;  %v549_v2 = vunpack.c.l.bf16 %v545_v52  ;;  %v554_v3 = vcombine.high %v546_v55, %v546_v55  ;;  %v512_v26 = vld [vmem:[%s1335_s17 + $0x4] sm:$0x4]  ;;  %v577_v54 = vld [vmem:[%s1335_s17 + $0x4] sm:$0x8]  ;;  %v578_v55 = vld [vmem:[%s1335_s17 + $0xc] sm:$0x8] }
  0x36   : > { %403 = vrot.lane.b32.xlu1 %v402_v63, %s1270_s26  ;;  %v331_v6 = vsel %vm188_vm1, %v326_v46, %v330_v1  ;;  %v555_v7 = vcombine.high %v547_v56, %v547_v56  ;;  %v556_v8 = vcombine.high %v548_v61, %v548_v61  ;;  %v464_v9 = vunpack.c.l.bf16 %v460_v57  ;;  %s1291_s26 = smov 118  }
  0x37   : > { %v333_v10 = vsel %vm191_vm2, %v332_v59, %v331_v6  ;;  %v557_v11 = vcombine.high %v549_v2, %v549_v2  ;;  %v558_v12 = vrot.slane %v554_v3, 1  ;;  %v465_v13 = vunpack.c.l.bf16 %v461_v62  ;;  %v580_v2 = vld [vmem:[%s1335_s17 + $0x1c] sm:$0x8] }
  0x38   : > { %v334_v15 = vsel %vm193_vm3, %v332_v59, %v333_v10  ;;  %v561_v16 = vrot.slane %v556_v8, 7  ;;  %v466_v17 = vunpack.c.l.bf16 %v462_v4  ;;  %v467_v18 = vunpack.c.l.bf16 %v463_v5 }
  0x39   : > { %v336_v21 = vsel %vm196_vm4, %v335_v60, %v334_v15  ;;  %v559_v22 = vsel %vm186_vm0, %v555_v7, %v558_v12  ;;  %v564_v23 = vrot.slane %v557_v11, 6  ;;  %v472_v24 = vrot.slane %v464_v9, 2  ;;  %v608_v12 = vld [vmem:[%s1335_s17 + $0xc] sm:$0x8] }
  0x3a   : > { %v337_v27 = vsel %vm198_vm5, %v335_v60, %v336_v21  ;;  %v560_v28 = vsel %vm188_vm1, %v555_v7, %v559_v22  ;;  %v473_v29 = vrot.slane %v465_v13, 1  ;;  %v478_v30 = vrot.slane %v467_v18, 7  ;;  %v579_v60 = vld [vmem:[%s1335_s17 + $0x14] sm:$0x8]  ;;  %v607_v7 = vld [vmem:[%s1335_s17 + $0x4] sm:$0x8] }
  0x3b   : > { %338 = vrot.lane.b32.xlu0 %v337_v27, %s1271_s27  ;;  %v562_v31 = vsel %vm191_vm2, %v561_v16, %v560_v28  ;;  %v490_v32 = vunpack.c.l.bf16 %v486_v14  ;;  %v491_v33 = vunpack.c.l.bf16 %v487_v19  ;;  %v492_v34 = vunpack.c.l.bf16 %v488_v20  ;;  %v610_v20 = vld [vmem:[%s1335_s17 + $0x1c] sm:$0x8] }
  0x3c   : > { %v563_v36 = vsel %vm193_vm3, %v561_v16, %v562_v31  ;;  %v474_v37 = vsel %vm186_vm0, %v473_v29, %v472_v24  ;;  %v493_v38 = vunpack.c.l.bf16 %v489_v25  ;;  %v516_v41 = vunpack.c.l.bf16 %v512_v26 }
  0x3d   : > { %v565_v42 = vsel %vm196_vm4, %v564_v23, %v563_v36  ;;  %v475_v43 = vsel %vm188_vm1, %v473_v29, %v474_v37  ;;  %v498_v44 = vrot.slane %v490_v32, 3  ;;  %v499_v45 = vrot.slane %v491_v33, 2 }
  0x3e   : > { %v566_v46 = vsel %vm198_vm5, %v564_v23, %v565_v42  ;;  %v476_v47 = vsel %vm191_vm2, %v466_v17, %v475_v43  ;;  %v502_v48 = vrot.slane %v492_v34, 1  ;;  %v517_v49 = vunpack.c.l.bf16 %v513_v35 }
  0x3f   : > { %567 = vrot.lane.b32.xlu1 %v566_v46, %s1272_s28  ;;  %v477_v50 = vsel %vm193_vm3, %v466_v17, %v476_v47  ;;  %v500_v51 = vsel %vm186_vm0, %v499_v45, %v498_v44  ;;  %v518_v52 = vunpack.c.l.bf16 %v514_v39  ;;  %v519_v53 = vunpack.c.l.bf16 %v515_v40  ;;  %v609_v17 = vld [vmem:[%s1335_s17 + $0x14] sm:$0x8]  ;;  %s1293_s28 = smov 116  }
  0x40   : > { %v479_v56 = vsel %vm196_vm4, %v478_v30, %v477_v50  ;;  %v501_v57 = vsel %vm188_vm1, %v499_v45, %v500_v51  ;;  %v524_v58 = vcombine.high %v516_v41, %v516_v41  ;;  %v525_v59 = vcombine.high %v517_v49, %v517_v49 }
  0x41   : > { %v480_v61 = vsel %vm198_vm5, %v478_v30, %v479_v56  ;;  %v503_v62 = vsel %vm191_vm2, %v502_v48, %v501_v57  ;;  %v526_v63 = vcombine.high %v518_v52, %v518_v52  ;;  %v527_v1 = vcombine.high %v519_v53, %v519_v53 }
  0x42   : > { %481 = vrot.lane.b32.xlu0 %v480_v61, %s1273_s29  ;;  %v504_v3 = vsel %vm193_vm3, %v502_v48, %v503_v62  ;;  %v528_v4 = vrot.slane %v525_v59, 7  ;;  %v581_v5 = vunpack.c.l.bf16 %v577_v54  ;;  %v582_v6 = vunpack.c.l.bf16 %v578_v55  ;;  %s1294_s29 = smov 104  }
  0x43   : > { %v505_v8 = vsel %vm196_vm4, %v493_v38, %v504_v3  ;;  %v531_v9 = vrot.slane %v526_v63, 6  ;;  %v534_v10 = vrot.slane %v527_v1, 5  ;;  %v583_v11 = vunpack.c.l.bf16 %v579_v60 }
  0x44   : > { %v506_v13 = vsel %vm198_vm5, %v493_v38, %v505_v8  ;;  %v529_v14 = vsel %vm186_vm0, %v528_v4, %v524_v58  ;;  %v584_v15 = vunpack.c.l.bf16 %v580_v2  ;;  %v589_v16 = vcombine.high %v581_v5, %v581_v5 }
  0x45   : > { %v530_v18 = vsel %vm188_vm1, %v528_v4, %v529_v14  ;;  %v590_v19 = vcombine.high %v582_v6, %v582_v6  ;;  %v611_v21 = vunpack.c.l.bf16 %v607_v7  ;;  %v612_v25 = vunpack.c.l.bf16 %v608_v12 }
  0x46   : > { %507 = vrot.lane.b32.xlu0 %v506_v13, %s1274_s30  ;;  %v532_v22 = vsel %vm191_vm2, %v531_v9, %v530_v18  ;;  %v592_v23 = vcombine.high %v584_v15, %v584_v15  ;;  %v593_v24 = vrot.slane %v589_v16, 2  ;;  %v591_v27 = vcombine.high %v583_v11, %v583_v11  ;;  %s1295_s30 = smov 112  }
  0x47   : > { %v533_v26 = vsel %vm193_vm3, %v531_v9, %v532_v22  ;;  %v594_v28 = vrot.slane %v590_v19, 1  ;;  %v613_v29 = vunpack.c.l.bf16 %v609_v17  ;;  %v614_v31 = vunpack.c.l.bf16 %v610_v20  ;;  %v853_v19 = vld [vmem:[%s1610_s2] sm:$0xff] }
  0x48   : > { %v535_v30 = vsel %vm196_vm4, %v534_v10, %v533_v26  ;;  %v619_v32 = vcombine.high %v611_v21, %v611_v21  ;;  %v620_v33 = vcombine.high %v612_v25, %v612_v25  ;;  %v599_v36 = vrot.slane %v592_v23, 7 }
  0x49   : > { %v536_v34 = vsel %vm198_vm5, %v534_v10, %v535_v30  ;;  %v595_v35 = vsel %vm186_vm0, %v594_v28, %v593_v24  ;;  %v621_v37 = vcombine.high %v613_v29, %v613_v29  ;;  %v622_v44 = vcombine.high %v614_v31, %v614_v31 }
  0x4a   : > { %537 = vrot.lane.b32.xlu1 %v536_v34, %s1275_s4  ;;  %v596_v38 = vsel %vm188_vm1, %v594_v28, %v595_v35  ;;  %v623_v39 = vrot.slane %v619_v32, 3  ;;  %v624_v40 = vrot.slane %v620_v33, 2  ;;  %v1283_v16 = vmov 0.0|0.0   ;;  %s1296_s4 = smov 102  }
  0x4b   : > { %v597_v41 = vsel %vm191_vm2, %v591_v27, %v596_v38  ;;  %v627_v42 = vrot.slane %v621_v37, 1  ;;  %1197 = vmatprep.subr.bf16.mxu1 %v1283_v16  ;;  %v1285_v18 = vmov 0  }
  0x4c   : > { %v598_v43 = vsel %vm193_vm3, %v591_v27, %v597_v41  ;;  %v625_v45 = vsel %vm186_vm0, %v624_v40, %v623_v39  ;;  %vm406_vm0 = vcmask 265352   ;;  %1248 = vset.pattern.permute.xlu0 %v1285_v18 }
  0x4d   : > { %v600_v46 = vsel %vm196_vm4, %v599_v36, %v598_v43  ;;  %v626_v47 = vsel %vm188_vm1, %v624_v40, %v625_v45  ;;  %vm432_vm1 = vcmask 412952  }
  0x4e   : > { %v601_v48 = vsel %vm198_vm5, %v599_v36, %v600_v46  ;;  %v628_v49 = vsel %vm191_vm2, %v627_v42, %v626_v47  ;;  %vm458_vm2 = vcmask 560552  }
  0x4f   : > { %602 = vrot.lane.b32.xlu0 %v601_v48, %s1276_s5  ;;  %v629_v50 = vsel %vm193_vm3, %v627_v42, %v628_v49  ;;  %vm484_vm3 = vcmask 708152   ;;  %s1297_s5 = smov 98  }
  0x50   : > { %v630_v51 = vsel %vm196_vm4, %v622_v44, %v629_v50  ;;  %vm510_vm4 = vcmask 855752  }
  0x51   : > { %v631_v52 = vsel %vm198_vm5, %v622_v44, %v630_v51  ;;  %vm573_vm5 = vcmask 1044456  }
  0x52   : > { %632 = vrot.lane.b32.xlu1 %v631_v52, %s1277_s6 }
  0x8d   : > { %v253_v54 = vpop.permute.xlu1 %252 }
  0x8e   : > { %v201_v53 = vpop.permute.xlu0 %200 }
  0x8f   : > { %204 = vst.msk [vmem:[#allocation2] sm:$0xf] %vm203_vm6, %v201_v53  ;;  %vm574_vm6 = vcmask 105476  }
  0x91   : > { %v279_v55 = vpop.permute.xlu1 %278 }
  0x95   : > { %v227_v56 = vpop.permute.xlu0 %226 }
  0x96   : > { %230 = vst.msk [vmem:[#allocation2] sm:$0xf] %vm229_vm7, %v227_v56  ;;  %vm570_vm7 = vcmask 1022976  }
  0x97   : > { %256 = vst.msk [vmem:[#allocation2] sm:$0xf] %vm255_vm8, %v253_v54  ;;  %vm540_vm8 = vcmask 1003352  }
  0x98   : > { %282 = vst.msk [vmem:[#allocation2] sm:$0xf] %vm281_vm9, %v279_v55  ;;  %v456_v57 = vpop.permute.xlu1 %455  ;;  %vm575_vm9 = vmor %vm574_vm6, %vm573_vm5  ;;  %vm859_vm5 = vcmask 293888   ;;  %vm1017_vm6 = vcmask 130048  }
  0x9b   : > { %v430_v58 = vpop.permute.xlu0 %429 }
  0xa1   : > { %v309_v59 = vpop.permute.xlu1 %308 }
  0xa2   : > { %312 = vst.msk [vmem:[#allocation2] sm:$0xf] %vm311_vm10, %v309_v59  ;;  %vm605_vm10 = vcmask 248952  }
  0xa5   : > { %v369_v60 = vpop.permute.xlu0 %368 }
  0xa6   : > { %v370_v61 = vrot.slane %v369_v60, 4 }
  0xa8   : > { %v372_v63 = vsel %vm371_vm13, %v370_v61, %v369_v60  ;;  %v404_v1 = vpop.permute.xlu1 %403 }
  0xad   : > { %v339_v62 = vpop.permute.xlu0 %338 }
  0xae   : > { %342 = vst.msk [vmem:[#allocation2] sm:$0xf] %vm341_vm14, %v339_v62  ;;  %vm682_vm14 = vcmask 1031168  }
  0xaf   : > { %377 = vst.msk [vmem:[#allocation2] sm:$0xff] %vm376_vm15, %v372_v63  ;;  %vm706_vm15 = vcmask 900096  }
  0xb0   : > { %407 = vst.msk [vmem:[#allocation2 + $0x4] sm:$0xf] %vm406_vm0, %v404_v1  ;;  %vm730_vm0 = vcmask 891904  }
  0xb1   : > { %433 = vst.msk [vmem:[#allocation2 + $0x4] sm:$0xf] %vm432_vm1, %v430_v58  ;;  %v568_v3 = vpop.permute.xlu1 %567  ;;  %vm778_vm1 = vcmask 752640  }
  0xb2   : > { %459 = vst.msk [vmem:[#allocation2 + $0x4] sm:$0xf] %vm458_vm2, %v456_v57  ;;  %v569_v5 = vrot.slane %v568_v3, 4  ;;  %vm754_vm2 = vcmask 883712  }
  0xb4   : > { %v482_v2 = vpop.permute.xlu0 %481  ;;  %v571_v7 = vsel %vm570_vm7, %v569_v5, %v568_v3  ;;  %vm1023_vm7 = vcmask 261248  }
  0xb5   : > { %485 = vst.msk [vmem:[#allocation2 + $0x4] sm:$0xf] %vm484_vm3, %v482_v2  ;;  %vm802_vm3 = vcmask 744448  }
  0xb8   : > { %v508_v4 = vpop.permute.xlu0 %507 }
  0xb9   : > { %511 = vst.msk [vmem:[#allocation2 + $0x4] sm:$0xf] %vm510_vm4, %v508_v4  ;;  %vm826_vm4 = vcmask 736256  }
  0xbc   : > { %v538_v6 = vpop.permute.xlu1 %537 }
  0xbd   : > { %541 = vst.msk [vmem:[#allocation2 + $0x4] sm:$0xf] %vm540_vm8, %v538_v6  ;;  %vm1028_vm8 = vcmask 392448  }
  0xbe   : > { %576 = vst.msk [vmem:[#allocation2 + $0x4] sm:$0xff] %vm575_vm9, %v571_v7  ;;  %vm1033_vm9 = vcmask 523648  }
  0xc1   : > { %v603_v8 = vpop.permute.xlu0 %602 }
  0xc2   : > { %606 = vst.msk [vmem:[#allocation2 + $0x8] sm:$0xf] %vm605_vm10, %v603_v8  ;;  %vm1038_vm10 = vcmask 654848  }
  0xc4   : > { %v633_v9 = vpop.permute.xlu1 %632 }
  0xc5   : > { %v668_v10 = vld [vmem:[#allocation2] sm:$0xff]  ;;  %636 = vst.msk [vmem:[#allocation2 + $0x8] sm:$0xf] %vm635_vm11, %v633_v9  ;;  %vm1043_vm11 = vcmask 786048  }
  0xc6   : > { %674 = vrot.lane.b32.xlu1 %v668_v10, %s1278_s7  ;;  %v672_v11 = vcombine.high %v668_v10, %v668_v10  ;;  %653 = vrot.lane.b32.xlu0 %v668_v10, %s1269_s25  ;;  %642 = vst [vmem:[#allocation3] sm:$0xf] %v668_v10  ;;  %v649_v13 = vcombine.low %v668_v10, %v668_v10 }
  0xc8   : > { %643 = vst [vmem:[#allocation3 + $0x8] sm:$0xf] %v672_v11 }
  0xca   : > { %748 = vrot.lane.b32.xlu1 %v668_v10, %s1279_s8  ;;  %700 = vrot.lane.b32.xlu0 %v668_v10, %s1280_s9 }
  0xcc   : > { %v638_v12 = vld [vmem:[#allocation2 + $0x8] sm:$0xf] }
  0xcd   : > { %644 = vst [vmem:[#allocation3 + $0x10] sm:$0xf] %v638_v12  ;;  %v717_v14 = vld [vmem:[#allocation2 + $0x8] sm:$0xff] }
  0xce   : > { %796 = vrot.lane.b32.xlu1 %v668_v10, %s1268_s24  ;;  %676 = vrot.lane.b32.xlu0 %v672_v11, %s1278_s7  ;;  %v650_v15 = vcombine.low %v717_v14, %v717_v14  ;;  %v721_v17 = vcombine.high %v717_v14, %v717_v14 }
  0xd2   : > { %722 = vrot.lane.b32.xlu1 %v668_v10, %s1271_s27  ;;  %651 = vrot.lane.b32.xlu0 %v649_v13, %s1269_s25 }
  0xd6   : > { %770 = vrot.lane.b32.xlu1 %v668_v10, %s1281_s10  ;;  %698 = vrot.lane.b32.xlu0 %v649_v13, %s1280_s9 }
  0xda   : > { %726 = vrot.lane.b32.xlu0 %v717_v14, %s1271_s27  ;;  %678 = vrot.lane.b32.xlu1 %v717_v14, %s1278_s7 }
  0xde   : > { %774 = vrot.lane.b32.xlu0 %v717_v14, %s1281_s10  ;;  %724 = vrot.lane.b32.xlu1 %v672_v11, %s1271_s27 }
  0xe2   : > { %746 = vrot.lane.b32.xlu0 %v649_v13, %s1279_s8  ;;  %772 = vrot.lane.b32.xlu1 %v672_v11, %s1281_s10 }
  0xe6   : > { %794 = vrot.lane.b32.xlu0 %v649_v13, %s1268_s24  ;;  %657 = vrot.lane.b32.xlu1 %v717_v14, %s1269_s25 }
  0xea   : > { %820 = vrot.lane.b32.xlu0 %v672_v11, %s1282_s11  ;;  %704 = vrot.lane.b32.xlu1 %v717_v14, %s1280_s9 }
  0xee   : > { %750 = vrot.lane.b32.xlu0 %v650_v15, %s1279_s8  ;;  %655 = vrot.lane.b32.xlu1 %v650_v15, %s1269_s25  ;;  %s1290_s25 = smov 120  }
  0xf2   : > { %798 = vrot.lane.b32.xlu0 %v650_v15, %s1268_s24  ;;  %702 = vrot.lane.b32.xlu1 %v650_v15, %s1280_s9 }
  0xf6   : > { %680 = vrot.lane.b32.xlu0 %v721_v17, %s1278_s7  ;;  %822 = vrot.lane.b32.xlu1 %v717_v14, %s1282_s11 }
  0xfa   : > { %728 = vrot.lane.b32.xlu0 %v721_v17, %s1271_s27  ;;  %752 = vrot.lane.b32.xlu1 %v717_v14, %s1279_s8  ;;  %s1292_s27 = smov 106  }
  0xfe   : > { %776 = vrot.lane.b32.xlu0 %v721_v17, %s1281_s10  ;;  %800 = vrot.lane.b32.xlu1 %v717_v14, %s1268_s24  ;;  %s1289_s24 = smov 122  }
 0x102   : > { %818 = vrot.lane.b32.xlu0 %v668_v10, %s1282_s11  ;;  %824 = vrot.lane.b32.xlu1 %v721_v17, %s1282_s11 }
 0x106   : > { %856 = vperm.xlu0 %1248, %v853_v19  }
 0x138   : > { %v675_v20 = vpop.permute.xlu1 %674  ;;  %v654_v21 = vpop.permute.xlu0 %653 }
 0x13c   : > { %v749_v22 = vpop.permute.xlu1 %748  ;;  %v701_v23 = vpop.permute.xlu0 %700 }
 0x140   : > { %v797_v24 = vpop.permute.xlu1 %796  ;;  %v677_v25 = vpop.permute.xlu0 %676 }
 0x141   : > { %v683_v26 = vsel %vm682_vm14, %v675_v20, %v677_v25 }
 0x142   : > { %689 = vst [vmem:[#allocation3 + $0x18] sm:$0xf] %v683_v26 }
 0x144   : > { %v723_v27 = vpop.permute.xlu1 %722  ;;  %v652_v28 = vpop.permute.xlu0 %651 }
 0x145   : > { %v659_v29 = vsel %vm371_vm13, %v652_v28, %v654_v21 }
 0x146   : > { %665 = vst [vmem:[#allocation3] sm:$0xf0] %v659_v29 }
 0x148   : > { %v771_v30 = vpop.permute.xlu1 %770  ;;  %v699_v31 = vpop.permute.xlu0 %698 }
 0x149   : > { %v707_v32 = vsel %vm706_vm15, %v699_v31, %v701_v23 }
 0x14a   : > { %713 = vst [vmem:[#allocation3 + $0x18] sm:$0xf0] %v707_v32 }
 0x14c   : > { %v679_v33 = vpop.permute.xlu1 %678  ;;  %v727_v34 = vpop.permute.xlu0 %726 }
 0x14d   : > { %v684_v35 = vsel %vm682_vm14, %v677_v25, %v679_v33  ;;  %v838_v10 = vld [vmem:[#allocation3] sm:$0xff] }
 0x14e   : > { %690 = vst [vmem:[#allocation3 + $0x20] sm:$0xf] %v684_v35 }
 0x150   : > { %v725_v36 = vpop.permute.xlu1 %724  ;;  %v1534_v37 = vpop.permute.xlu0 %774 }
 0x151   : > { %v731_v38 = vsel %vm730_vm0, %v723_v27, %v725_v36  ;;  %v732_v39 = vsel %vm730_vm0, %v725_v36, %v727_v34  ;;  %v841_v3 = vld [vmem:[#allocation3 + $0x18] sm:$0xff] }
 0x152   : > { %737 = vst [vmem:[#allocation3 + $0x30] sm:$0xf] %v731_v38  ;;  %738 = vst [vmem:[#allocation3 + $0x38] sm:$0xf] %v732_v39  ;;  %v1191_v11 = vpack.c.bf16 %v841_v3, %v838_v10 }
 0x154   : > { %v773_v40 = vpop.permute.xlu1 %772  ;;  %v747_v41 = vpop.permute.xlu0 %746 }
 0x155   : > { %v779_v42 = vsel %vm778_vm1, %v771_v30, %v773_v40  ;;  %v780_v43 = vsel %vm778_vm1, %v773_v40, %v1534_v37  ;;  %v755_v44 = vsel %vm754_vm2, %v747_v41, %v749_v22  ;;  %v836_v30 = vld [vmem:[%s1609_s1] sm:$0xf] }
 0x156   : > { %785 = vst [vmem:[#allocation3 + $0x48] sm:$0xf] %v779_v42  ;;  %786 = vst [vmem:[#allocation3 + $0x50] sm:$0xf] %v780_v43 }
 0x157   : > { %761 = vst [vmem:[#allocation3 + $0x30] sm:$0xf0] %v755_v44 }
 0x158   : > { %v658_v45 = vpop.permute.xlu1 %657  ;;  %v795_v46 = vpop.permute.xlu0 %794 }
 0x159   : > { %v803_v47 = vsel %vm802_vm3, %v795_v46, %v797_v24 }
 0x15a   : > { %809 = vst [vmem:[#allocation3 + $0x48] sm:$0xf0] %v803_v47 }
 0x15c   : > { %v705_v48 = vpop.permute.xlu1 %704  ;;  %v821_v49 = vpop.permute.xlu0 %820 }
 0x160   : > { %v656_v50 = vpop.permute.xlu1 %655  ;;  %v751_v51 = vpop.permute.xlu0 %750 }
 0x161   : > { %v660_v52 = vsel %vm371_vm13, %v654_v21, %v656_v50  ;;  %v661_v53 = vsel %vm371_vm13, %v656_v50, %v658_v45  ;;  %v756_v54 = vsel %vm754_vm2, %v749_v22, %v751_v51  ;;  %v847_v17 = vld [vmem:[#allocation3 + $0x48] sm:$0xff]  ;;  %vm863_vm13 = vcmask 1043456  }
 0x162   : > { %666 = vst [vmem:[#allocation3 + $0x8] sm:$0xf0] %v660_v52  ;;  %667 = vst [vmem:[#allocation3 + $0x10] sm:$0xf0] %v661_v53 }
 0x163   : > { %762 = vst [vmem:[#allocation3 + $0x38] sm:$0xf0] %v756_v54 }
 0x164   : > { %v703_v55 = vpop.permute.xlu1 %702  ;;  %v799_v56 = vpop.permute.xlu0 %798 }
 0x165   : > { %v708_v57 = vsel %vm706_vm15, %v701_v23, %v703_v55  ;;  %v709_v58 = vsel %vm706_vm15, %v703_v55, %v705_v48  ;;  %v804_v59 = vsel %vm802_vm3, %v797_v24, %v799_v56  ;;  %v844_v23 = vld [vmem:[#allocation3 + $0x30] sm:$0xff]  ;;  %vm1058_vm15 = vcmask 1048448  }
 0x166   : > { %714 = vst [vmem:[#allocation3 + $0x20] sm:$0xf0] %v708_v57  ;;  %715 = vst [vmem:[#allocation3 + $0x28] sm:$0xf0] %v709_v58  ;;  %v1195_v24 = vpack.c.bf16 %v847_v17, %v844_v23 }
 0x167   : > { %810 = vst [vmem:[#allocation3 + $0x50] sm:$0xf0] %v804_v59 }
 0x168   : > { %v823_v60 = vpop.permute.xlu1 %822  ;;  %v681_v61 = vpop.permute.xlu0 %680 }
 0x169   : > { %v828_v62 = vsel %vm826_vm4, %v821_v49, %v823_v60  ;;  %v685_v63 = vsel %vm682_vm14, %v679_v33, %v681_v61  ;;  %v839_v6 = vld [vmem:[#allocation3 + $0x8] sm:$0xff]  ;;  %v840_v20 = vld [vmem:[#allocation3 + $0x10] sm:$0xff]  ;;  %vm1089_vm14 = vcmask 818176  }
 0x16a   : > { %834 = vst [vmem:[#allocation3 + $0x68] sm:$0xf] %v828_v62  ;;  %691 = vst [vmem:[#allocation3 + $0x28] sm:$0xf] %v685_v63  ;;  %v845_v12 = vld [vmem:[#allocation3 + $0x38] sm:$0xff] }
 0x16c   : > { %v753_v1 = vpop.permute.xlu1 %752  ;;  %v729_v2 = vpop.permute.xlu0 %728 }
 0x16d   : > { %v757_v4 = vsel %vm754_vm2, %v751_v51, %v753_v1  ;;  %v733_v5 = vsel %vm730_vm0, %v727_v34, %v729_v2  ;;  %v842_v7 = vld [vmem:[#allocation3 + $0x20] sm:$0xff]  ;;  %v837_v34 = vunpack.c.l.bf16 %v836_v30  ;;  %vm1055_vm0 = vcmask 932864  }
 0x16e   : > { %v848_v8 = vld [vmem:[#allocation3 + $0x50] sm:$0xff]  ;;  %763 = vst [vmem:[#allocation3 + $0x40] sm:$0xf0] %v757_v4  ;;  %739 = vst [vmem:[#allocation3 + $0x40] sm:$0xf] %v733_v5  ;;  %v1189_v9 = vpack.c.bf16 %v842_v7, %v839_v6 }
 0x16f   : > { %v1193_v15 = vpack.c.bf16 %v848_v8, %v845_v12 }
 0x170   : > { %v801_v13 = vpop.permute.xlu1 %800  ;;  %1190 = vmatprep.subr.bf16.mxu0 %v1189_v9  ;;  %v777_v14 = vpop.permute.xlu0 %776 }
 0x171   : > { %v805_v18 = vsel %vm802_vm3, %v799_v56, %v801_v13  ;;  %v781_v19 = vsel %vm778_vm1, %v1534_v37, %v777_v14  ;;  %1192 = vmatpush1.bf16.msra.mxu0 %v1191_v11  ;;  %v843_v21 = vld [vmem:[#allocation3 + $0x28] sm:$0xff] }
 0x172   : > { %811 = vst [vmem:[#allocation3 + $0x58] sm:$0xf0] %v805_v18  ;;  %787 = vst [vmem:[#allocation3 + $0x58] sm:$0xf] %v781_v19  ;;  %1194 = vmatprep.subr.bf16.mxu0 %v1193_v15  ;;  %v1198_v22 = vpack.c.bf16 %v843_v21, %v840_v20  ;;  %v851_v29 = vld [vmem:[#allocation3 + $0x68] sm:$0xf] }
 0x174   : > { %v825_v25 = vpop.permute.xlu1 %824  ;;  %1199 = vmatpush3.bf16.msra.mxu1 %v1198_v22  ;;  %v819_v26 = vpop.permute.xlu0 %818 }
 0x175   : > { %v829_v27 = vsel %vm826_vm4, %v823_v60, %v825_v25  ;;  %v827_v28 = vsel %vm826_vm4, %v819_v26, %v821_v49  ;;  %1196 = vmatpush1.bf16.msra.mxu0 %v1195_v24  ;;  %1200 = vmatprep.subr.bf16.mxu1 %v1283_v16  ;;  %v846_v31 = vld [vmem:[#allocation3 + $0x40] sm:$0xff] }
 0x176   : > { %835 = vst [vmem:[#allocation3 + $0x70] sm:$0xf] %v829_v27  ;;  %833 = vst [vmem:[#allocation3 + $0x60] sm:$0xf] %v827_v28  ;;  %1161 = vmatprep.subr.msk.mxu0 %vm863_vm13, %v851_v29 }
 0x179   : > { %v849_v32 = vld [vmem:[#allocation3 + $0x58] sm:$0xff] }
 0x17a   : > { %v1201_v33 = vpack.c.bf16 %v849_v32, %v846_v31 }
 0x17c   : > { %1202 = vmatpush3.bf16.msra.mxu1 %v1201_v33 }
 0x17d   : > { %v850_v35 = vld [vmem:[#allocation3 + $0x60] sm:$0xf]  ;;  %1184 = vmatprep.subr.mxu1 %v1261_v0  ;;  %v852_v16 = vld [vmem:[#allocation3 + $0x70] sm:$0xf] }
 0x17e   : > { %1162 = vmatpush1.msk.msra.mxu0 %vm863_vm13, %v850_v35 }
 0x17f   : > { %1163 = vmatmul.mubr.msk.f32.vlgmr.msra.gmra.mrb[0].mxu0 %vm859_vm5, %v837_v34 }
 0x180   : > { %1185 = vmatpush3.msk.msra.mxu1 %vm863_vm13, %v852_v16 }
 0x181   : > { %1187 = vmatmul.mubr.msk.f32.vlgmr.msra.gmra.mrb[0].mxu1 %vm859_vm5, %v837_v34 }
 0x185   : > { %v857_v36 = vpop.permute.xlu0 %856 }
 0x252   : > { %v939_v37 = vpop.f32.mrb[0].mxu0 }
 0x253   : > { %v940_v38 = vadd.f32 %v939_v37, %v857_v36  ;;  %v941_v39 = vpop.f32.mrb[1].mxu0 }
 0x254   : > { %v1010_v40 = vpop.f32.mrb[0].mxu1  ;;  %v942_v44 = vadd.f32 %v941_v39, %v857_v36 }
 0x255   : > { %v1014_v0 = vmax.f32 %v940_v38, 0.0  ;;  %v1011_v41 = vadd.f32 %v1010_v40, %v857_v36  ;;  %v1188_v42 = vpop.f32.mrb[1].mxu1 }
 0x256   : > { %v1015_v45 = vmax.f32 %v942_v44, 0.0 }
 0x257   : > { %v1016_v43 = vmax.f32 %v1011_v41, 0.0  ;;  %1020 = vrot.lane.b32.xlu1 %v1014_v0, %s1278_s7  ;;  %1018 = vst.msk [vmem:[%s1570_s21] sm:$0xff] %vm1017_vm6, %v1014_v0 }
 0x259   : > { %1087 = vrot.lane.b32.xlu0 %v1016_v43, %s1286_s13 }
 0x25b   : > { %1025 = vrot.lane.b32.xlu1 %v1014_v0, %s1287_s22 }
 0x25d   : > { %1051 = vrot.lane.b32.xlu0 %v1014_v0, %s1288_s23 }
 0x25f   : > { %1030 = vrot.lane.b32.xlu1 %v1014_v0, %s1289_s24 }
 0x261   : > { %1064 = vrot.lane.b32.xlu0 %v1015_v45, %s1280_s9 }
 0x263   : > { %1035 = vrot.lane.b32.xlu1 %v1014_v0, %s1290_s25 }
 0x265   : > { %1068 = vrot.lane.b32.xlu0 %v1015_v45, %s1279_s8 }
 0x267   : > { %1040 = vrot.lane.b32.xlu1 %v1014_v0, %s1291_s26 }
 0x269   : > { %1072 = vrot.lane.b32.xlu0 %v1015_v45, %s1292_s27 }
 0x26b   : > { %1045 = vrot.lane.b32.xlu1 %v1014_v0, %s1293_s28 }
 0x26d   : > { %1076 = vrot.lane.b32.xlu0 %v1015_v45, %s1294_s29 }
 0x26f   : > { %1060 = vrot.lane.b32.xlu1 %v1015_v45, %s1295_s30 }
 0x271   : > { %1080 = vrot.lane.b32.xlu0 %v1015_v45, %s1296_s4 }
 0x273   : > { %1085 = vrot.lane.b32.xlu1 %v1015_v45, %s1286_s13 }
 0x275   : > { %1093 = vrot.lane.b32.xlu0 %v1016_v43, %s1297_s5 }
 0x277   : > { %1053 = vrot.lane.b32.xlu1 %v1015_v45, %s1288_s23 }
 0x2c9   : > { %v1021_v46 = vpop.permute.xlu1 %1020 }
 0x2ca   : > { %1024 = vst.msk [vmem:[%s1570_s21] sm:$0xff] %vm1023_vm7, %v1021_v46 }
 0x2cb   : > { %v1088_v47 = vpop.permute.xlu0 %1087 }
 0x2cd   : > { %v1026_v48 = vpop.permute.xlu1 %1025 }
 0x2ce   : > { %1029 = vst.msk [vmem:[%s1570_s21] sm:$0xff] %vm1028_vm8, %v1026_v48 }
 0x2cf   : > { %v1052_v49 = vpop.permute.xlu0 %1051 }
 0x2d1   : > { %v1031_v50 = vpop.permute.xlu1 %1030 }
 0x2d2   : > { %1034 = vst.msk [vmem:[%s1570_s21] sm:$0xff] %vm1033_vm9, %v1031_v50 }
 0x2d3   : > { %v1065_v51 = vpop.permute.xlu0 %1064 }
 0x2d5   : > { %v1036_v52 = vpop.permute.xlu1 %1035 }
 0x2d6   : > { %1039 = vst.msk [vmem:[%s1570_s21] sm:$0xff] %vm1038_vm10, %v1036_v52 }
 0x2d7   : > { %v1069_v53 = vpop.permute.xlu0 %1068 }
 0x2d9   : > { %v1041_v54 = vpop.permute.xlu1 %1040 }
 0x2da   : > { %1044 = vst.msk [vmem:[%s1570_s21] sm:$0xff] %vm1043_vm11, %v1041_v54 }
 0x2db   : > { %v1073_v55 = vpop.permute.xlu0 %1072 }
 0x2dd   : > { %v1046_v56 = vpop.permute.xlu1 %1045 }
 0x2de   : > { %1049 = vst.msk [vmem:[%s1570_s21] sm:$0xff] %vm1048_vm12, %v1046_v56 }
 0x2df   : > { %v1077_v57 = vpop.permute.xlu0 %1076 }
 0x2e1   : > { %v1061_v58 = vpop.permute.xlu1 %1060 }
 0x2e2   : > { %1063 = vst.msk [vmem:[%s1570_s21 + $0x8] sm:$0xff] %vm1017_vm6, %v1061_v58 }
 0x2e3   : > { %1067 = vst.msk [vmem:[%s1570_s21 + $0x8] sm:$0xff] %vm1023_vm7, %v1065_v51  ;;  %v1081_v59 = vpop.permute.xlu0 %1080 }
 0x2e4   : > { %1071 = vst.msk [vmem:[%s1570_s21 + $0x8] sm:$0xff] %vm1028_vm8, %v1069_v53 }
 0x2e5   : > { %1075 = vst.msk [vmem:[%s1570_s21 + $0x8] sm:$0xff] %vm1033_vm9, %v1073_v55  ;;  %v1086_v60 = vpop.permute.xlu1 %1085 }
 0x2e6   : > { %1079 = vst.msk [vmem:[%s1570_s21 + $0x8] sm:$0xff] %vm1038_vm10, %v1077_v57  ;;  %v1090_v61 = vsel %vm1089_vm14, %v1086_v60, %v1088_v47 }
 0x2e7   : > { %1083 = vst.msk [vmem:[%s1570_s21 + $0x8] sm:$0xff] %vm1043_vm11, %v1081_v59  ;;  %v1094_v62 = vpop.permute.xlu0 %1093 }
 0x2e8   : > { %1092 = vst.msk [vmem:[%s1570_s21 + $0x8] sm:$0xff] %vm1048_vm12, %v1090_v61 }
 0x2e9   : > { %1096 = vst.msk [vmem:[%s1570_s21 + $0x8] sm:$0xff] %vm1058_vm15, %v1094_v62  ;;  %v1054_v63 = vpop.permute.xlu1 %1053 }
 0x2ea   : > { %v1056_v1 = vsel %vm1055_vm0, %v1052_v49, %v1054_v63 }
 0x2eb   : > { %1059 = vst.msk [vmem:[%s1570_s21] sm:$0xff] %vm1058_vm15, %v1056_v1 }
 0x2ec PF: > { %s13_s12 = sadd.s32 1, %s1259_s12  }
 0x2ed   : > { %p10_p4 = scmp.ge.s32.totalorder %s13_s12, 4  }
 0x2ef   :  { %12 = sbr.rel (!%p10_p4) target bundleno = 1 (0x1), region = 62 }

</bundles_post_ra>
